<compile_context>
chip_gen: v6e
topology: v6e:2x2x1
jax: 0.10.0
libtpu: 0.0.40
codegen_flags: <defaults>
</compile_context>

<pallas_src>
import math
from functools import partial

import jax
import jax.numpy as jnp
from jax.experimental import pallas as pl
from jax.experimental.pallas import tpu as pltpu


# ----------------------------- Pallas kernel --------------------------------
def _encoder_layer_kernel(
    x_ref,        # (1, S, E)  full-sequence input block (resident across q tiles)
    g1_ref,       # (1, E)     RMSNorm1 weight
    g2_ref,       # (1, E)     RMSNorm2 weight
    wq_ref,       # (E, E)     q weight^T, bf16, pre-scaled by 1/sqrt(head_dim)
    bq_ref,       # (1, E)     q bias, f32, pre-scaled
    wkv_ref,      # (E, 2E)    k/v weight^T, bf16
    bkv_ref,      # (1, 2E)    k/v bias, f32
    wo_ref,       # (E, E)     out_proj weight^T, bf16
    bo_ref,       # (1, E)
    w1_ref,       # (E, H)     mlp fc1 weight^T, bf16
    b1_ref,       # (1, H)
    w2_ref,       # (H, E)     mlp fc2 weight^T, bf16
    b2_ref,       # (1, E)
    o_ref,        # (1, TQ, E)
    kT_sc,        # (E, S) bf16  scratch: cached K^T   (persists across q tiles)
    v_sc,         # (S, E) bf16  scratch: cached V     (persists across q tiles)
    pv_sc,        # (TQ, E) bf16 scratch: per-head attention outputs slab
    *,
    embed_dim,
    num_heads,
    q_tile,
    eps,
):
    E = embed_dim
    D = E // num_heads
    TQ = q_tile

    # ---- K/V for the whole sequence: computed once per batch element --------
    @pl.when(pl.program_id(1) == 0)
    def _():
        xf = x_ref[0].astype(jnp.float32)                            # (S, E)
        r = jax.lax.rsqrt(jnp.mean(xf * xf, axis=-1, keepdims=True) + eps)
        hkv = (xf * r * g1_ref[...]).astype(jnp.bfloat16)            # rmsnorm1
        kv = jnp.dot(hkv, wkv_ref[...],
                     preferred_element_type=jnp.float32) + bkv_ref[...]
        kT_sc[...] = kv[:, :E].T.astype(jnp.bfloat16)                # (E, S)
        v_sc[...] = kv[:, E:].astype(jnp.bfloat16)                   # (S, E)

    # ---- query-tile rows of x (sliced from the resident full-seq block) -----
    row0 = pl.multiple_of(pl.program_id(1) * TQ, TQ)
    xq = x_ref[0, pl.ds(row0, TQ), :].astype(jnp.float32)            # (TQ, E)

    # RMS statistic computed once; both norms see the ORIGINAL x rows.
    rq = jax.lax.rsqrt(jnp.mean(xq * xq, axis=-1, keepdims=True) + eps)
    xqn = xq * rq
    hq = (xqn * g1_ref[...]).astype(jnp.bfloat16)                    # rmsnorm1
    h2 = (xqn * g2_ref[...]).astype(jnp.bfloat16)                    # rmsnorm2(x)

    # ---- Q projection (1/sqrt(D) folded into wq/bq) --------------------------
    q = (jnp.dot(hq, wq_ref[...], preferred_element_type=jnp.float32)
         + bq_ref[...]).astype(jnp.bfloat16)                         # (TQ, E)

    # ---- per-head attention; head outputs go into the bf16 slab --------------
    for h in range(num_heads):
        lo, hi = h * D, (h + 1) * D
        s = jnp.dot(q[:, lo:hi], kT_sc[lo:hi, :],
                    preferred_element_type=jnp.float32)              # (TQ, S)
        s = s - jnp.max(s, axis=-1, keepdims=True)
        p = jnp.exp(s)
        p = p * pl.reciprocal(jnp.sum(p, axis=-1, keepdims=True), approx=True)
        pv_sc[:, lo:hi] = jnp.dot(
            p.astype(jnp.bfloat16), v_sc[:, lo:hi],
            preferred_element_type=jnp.float32).astype(jnp.bfloat16)

    # ---- single full-width output projection + first residual ----------------
    attn = jnp.dot(pv_sc[...], wo_ref[...],
                   preferred_element_type=jnp.float32) + bo_ref[...]
    h1 = attn + xq

    # ---- MLP on rmsnorm2(original x); dropout p=0.0 -> identity --------------
    m = jnp.dot(h2, w1_ref[...], preferred_element_type=jnp.float32) + b1_ref[...]
    m = jnp.dot(m.astype(jnp.bfloat16), w2_ref[...],
                preferred_element_type=jnp.float32) + b2_ref[...]

    o_ref[0] = (m + h1).astype(o_ref.dtype)


# ------------------------------ Wrapper --------------------------------------
def encoder_layer(x, params, *, num_heads, eps=1e-6, q_tile=256):
    """x: (B, S, E) float32. Returns (B, S, E)."""
    B, S, E = x.shape
    assert E % num_heads == 0
    head_dim = E // num_heads
    H = params["w1"].shape[0]  # hidden_dim

    TQ = min(S, q_tile)
    assert S % TQ == 0, "sequence length must be divisible by the query tile"
    assert TQ == S or TQ % 8 == 0
    n_q = S // TQ

    scale = 1.0 / math.sqrt(head_dim)

    # Pre-transpose Linear weights so the kernel does plain x @ W; fold the
    # attention scale into the Q weight/bias; cast matmul weights to bf16.
    g1 = params["rms1_w"].reshape(1, E).astype(jnp.float32)
    g2 = params["rms2_w"].reshape(1, E).astype(jnp.float32)

    wqkv_t = params["wqkv"].T.astype(jnp.float32)             # (E, 3E)
    wq = (wqkv_t[:, :E] * scale).astype(jnp.bfloat16)          # (E, E)
    wkv = wqkv_t[:, E:].astype(jnp.bfloat16)                   # (E, 2E)
    bqkv = params["bqkv"].astype(jnp.float32)
    bq = (bqkv[:E] * scale).reshape(1, E)
    bkv = bqkv[E:].reshape(1, 2 * E)

    wo = params["wo"].T.astype(jnp.bfloat16)                   # (E, E)
    bo = params["bo"].reshape(1, E).astype(jnp.float32)
    w1 = params["w1"].T.astype(jnp.bfloat16)                   # (E, H)
    b1 = params["b1"].reshape(1, H).astype(jnp.float32)
    w2 = params["w2"].T.astype(jnp.bfloat16)                   # (H, E)
    b2 = params["b2"].reshape(1, E).astype(jnp.float32)

    kernel = partial(_encoder_layer_kernel, embed_dim=E, num_heads=num_heads,
                     q_tile=TQ, eps=eps)

    # Explicit VMEM budget with ~1/8 headroom (default scoped limit is 16-32 MiB).
    try:
        vmem_cap = pltpu.get_tpu_info().vmem_capacity_bytes
    except Exception:
        vmem_cap = 64 * 1024 * 1024                            # conservative (v7x)
    vmem_limit = min(int(vmem_cap * 7 // 8), 112 * 1024 * 1024)

    # Advisory cost estimate for XLA's scheduler.
    flops = (2 * B * S * E * 3 * E            # qkv projection
             + 4 * B * S * S * E              # scores + p@v (all heads)
             + 2 * B * S * E * E              # out projection
             + 4 * B * S * E * H)             # mlp
    transcendentals = B * num_heads * S * S + 4 * B * S
    bytes_accessed = (2 * B * S * E * 4
                      + (3 * E * E + E * E + 2 * E * H) * 2
                      + (3 * E + 3 * E + H) * 4)
    cost = pl.CostEstimate(flops=flops, transcendentals=transcendentals,
                           bytes_accessed=bytes_accessed)

    def run(single_buffer_weights):
        if single_buffer_weights:
            # Constant operands: index_map never changes -> single-buffer them.
            const = lambda shape: pl.BlockSpec(
                shape, lambda b, qi: (0,) * len(shape),
                pipeline_mode=pl.Buffered(1))
        else:
            const = lambda shape: pl.BlockSpec(
                shape, lambda b, qi: (0,) * len(shape))

        grid_spec = pltpu.PrefetchScalarGridSpec(
            num_scalar_prefetch=0,
            grid=(B, n_q),
            in_specs=[
                # x: full sequence block, resident across all q tiles of a batch.
                pl.BlockSpec((1, S, E), lambda b, qi: (b, 0, 0)),
                const((1, E)),          # rms1 weight
                const((1, E)),          # rms2 weight
                const((E, E)),          # wq^T  (bf16, pre-scaled)
                const((1, E)),          # bq    (pre-scaled)
                const((E, 2 * E)),      # wkv^T (bf16)
                const((1, 2 * E)),      # bkv
                const((E, E)),          # wo^T  (bf16)
                const((1, E)),          # bo
                const((E, H)),          # w1^T  (bf16)
                const((1, H)),          # b1
                const((H, E)),          # w2^T  (bf16)
                const((1, E)),          # b2
            ],
            out_specs=pl.BlockSpec((1, TQ, E), lambda b, qi: (b, qi, 0)),
            scratch_shapes=[
                pltpu.VMEM((E, S), jnp.bfloat16),    # cached K^T
                pltpu.VMEM((S, E), jnp.bfloat16),    # cached V
                pltpu.VMEM((TQ, E), jnp.bfloat16),   # per-head attn-out slab
            ],
        )
        return pl.pallas_call(
            kernel,
            out_shape=jax.ShapeDtypeStruct((B, S, E), x.dtype),
            grid_spec=grid_spec,
            compiler_params=pltpu.CompilerParams(
                # q axis must be sequential ("arbitrary") so the KV scratch
                # carries across query tiles; batch axis stays "parallel".
                dimension_semantics=("parallel", "arbitrary"),
                vmem_limit_bytes=vmem_limit,
            ),
            cost_estimate=cost,
        )(x, g1, g2, wq, bq, wkv, bkv, wo, bo, w1, b1, w2, b2)

    try:
        return run(single_buffer_weights=True)
    except Exception:
        # Fallback if pipeline_mode=pl.Buffered(1) is unsupported in this build.
        return run(single_buffer_weights=False)


# --------------------------- Pure-JAX reference -------------------------------
def _reference(x, params, *, num_heads, eps=1e-6):
    B, S, E = x.shape
    D = E // num_heads

    def rmsnorm(v, w):
        return v * jax.lax.rsqrt(jnp.mean(v * v, -1, keepdims=True) + eps) * w

    h = rmsnorm(x, params["rms1_w"])
    qkv = h @ params["wqkv"].T + params["bqkv"]
    q, k, v = jnp.split(qkv, 3, axis=-1)
    q = q.reshape(B, S, num_heads, D).transpose(0, 2, 1, 3)
    k = k.reshape(B, S, num_heads, D).transpose(0, 2, 1, 3)
    v = v.reshape(B, S, num_heads, D).transpose(0, 2, 1, 3)
    s = jnp.einsum("bhqd,bhkd->bhqk", q, k) / math.sqrt(D)
    p = jax.nn.softmax(s, axis=-1)
    a = jnp.einsum("bhqk,bhkd->bhqd", p, v).transpose(0, 2, 1, 3).reshape(B, S, E)
    a = a @ params["wo"].T + params["bo"]
    h1 = a + x
    h2 = rmsnorm(x, params["rms2_w"])
    m = h2 @ params["w1"].T + params["b1"]
    m = m @ params["w2"].T + params["b2"]
    return m + h1


# ------------------------------- Main -----------------------------------------
if __name__ == "__main__":
    B, S, E = 2, 8, 32
    num_heads = 4
    hidden_dim = 4 * E  # 128

    key = jax.random.PRNGKey(0)
    ks = jax.random.split(key, 8)

    params = {
        "rms1_w": jnp.ones((E,), jnp.float32),
        "rms2_w": jnp.ones((E,), jnp.float32),
        "wqkv": 0.02 * jax.random.normal(ks[0], (3 * E, E), jnp.float32),
        "bqkv": 0.01 * jax.random.normal(ks[1], (3 * E,), jnp.float32),
        "wo": 0.02 * jax.random.normal(ks[2], (E, E), jnp.float32),
        "bo": 0.01 * jax.random.normal(ks[3], (E,), jnp.float32),
        "w1": 0.02 * jax.random.normal(ks[4], (hidden_dim, E), jnp.float32),
        "b1": 0.01 * jax.random.normal(ks[5], (hidden_dim,), jnp.float32),
        "w2": 0.02 * jax.random.normal(ks[6], (E, hidden_dim), jnp.float32),
        "b2": 0.01 * jax.random.normal(ks[7], (E,), jnp.float32),
    }

    x = jax.random.normal(jax.random.PRNGKey(42), (B, S, E), jnp.float32)

    out = encoder_layer(x, params, num_heads=num_heads)
    out = jax.block_until_ready(out)

    ref = _reference(x, params, num_heads=num_heads)
    assert out.shape == (B, S, E)
    # bf16 MXU operands + approx reciprocal -> slightly looser tolerance than pure f32.
    assert jnp.allclose(out, ref, atol=2e-2, rtol=2e-2), (
        float(jnp.max(jnp.abs(out - ref)))
    )

    print("KERNEL_OK")
</pallas_src>

<mosaic_0001>
module attributes {stable_mosaic.version = 11 : i64} {
  func.func @_encoder_layer_kernel(%arg0: i32, %arg1: i32, %arg2: memref<1x8x32xf32, #tpu.memory_space<vmem>>, %arg3: memref<1x32xf32, #tpu.memory_space<vmem>>, %arg4: memref<1x32xf32, #tpu.memory_space<vmem>>, %arg5: memref<32x32xbf16, #tpu.memory_space<vmem>>, %arg6: memref<1x32xf32, #tpu.memory_space<vmem>>, %arg7: memref<32x64xbf16, #tpu.memory_space<vmem>>, %arg8: memref<1x64xf32, #tpu.memory_space<vmem>>, %arg9: memref<32x32xbf16, #tpu.memory_space<vmem>>, %arg10: memref<1x32xf32, #tpu.memory_space<vmem>>, %arg11: memref<32x128xbf16, #tpu.memory_space<vmem>>, %arg12: memref<1x128xf32, #tpu.memory_space<vmem>>, %arg13: memref<128x32xbf16, #tpu.memory_space<vmem>>, %arg14: memref<1x32xf32, #tpu.memory_space<vmem>>, %arg15: memref<1x8x32xf32, #tpu.memory_space<vmem>>, %arg16: memref<32x8xbf16, #tpu.memory_space<vmem>>, %arg17: memref<8x32xbf16, #tpu.memory_space<vmem>>, %arg18: memref<8x32xbf16, #tpu.memory_space<vmem>>) attributes {dimension_semantics = [#tpu.dimension_semantics<parallel>, #tpu.dimension_semantics<arbitrary>], iteration_bounds = array<i64: 2, 1>, scalar_prefetch = 0 : i64, scratch_operands = 3 : i64, tpu.core_type = #tpu.core_type<tc>, window_params = [{transform_indices = @transform_0, window_bounds = array<i64: 1, 8, 32>}, {pipeline_mode = #tpu.pipeline_mode<synchronous>, transform_indices = @transform_1, window_bounds = array<i64: 1, 32>}, {pipeline_mode = #tpu.pipeline_mode<synchronous>, transform_indices = @transform_2, window_bounds = array<i64: 1, 32>}, {pipeline_mode = #tpu.pipeline_mode<synchronous>, transform_indices = @transform_3, window_bounds = array<i64: 32, 32>}, {pipeline_mode = #tpu.pipeline_mode<synchronous>, transform_indices = @transform_4, window_bounds = array<i64: 1, 32>}, {pipeline_mode = #tpu.pipeline_mode<synchronous>, transform_indices = @transform_5, window_bounds = array<i64: 32, 64>}, {pipeline_mode = #tpu.pipeline_mode<synchronous>, transform_indices = @transform_6, window_bounds = array<i64: 1, 64>}, {pipeline_mode = #tpu.pipeline_mode<synchronous>, transform_indices = @transform_7, window_bounds = array<i64: 32, 32>}, {pipeline_mode = #tpu.pipeline_mode<synchronous>, transform_indices = @transform_8, window_bounds = array<i64: 1, 32>}, {pipeline_mode = #tpu.pipeline_mode<synchronous>, transform_indices = @transform_9, window_bounds = array<i64: 32, 128>}, {pipeline_mode = #tpu.pipeline_mode<synchronous>, transform_indices = @transform_10, window_bounds = array<i64: 1, 128>}, {pipeline_mode = #tpu.pipeline_mode<synchronous>, transform_indices = @transform_11, window_bounds = array<i64: 128, 32>}, {pipeline_mode = #tpu.pipeline_mode<synchronous>, transform_indices = @transform_12, window_bounds = array<i64: 1, 32>}, {transform_indices = @transform_13, window_bounds = array<i64: 1, 8, 32>}]} {
    %c0_i32 = arith.constant 0 : i32
    %0 = arith.cmpi eq, %arg1, %c0_i32 : i32
    %1 = arith.extui %0 : i1 to i32
    %c0_i32_0 = arith.constant 0 : i32
    %2 = arith.cmpi ne, %1, %c0_i32_0 : i32
    scf.if %2 {
      %c0_70 = arith.constant 0 : index
      %c0_71 = arith.constant 0 : index
      %c0_72 = arith.constant 0 : index
      %126 = vector.load %arg2[%c0_70, %c0_71, %c0_72] : memref<1x8x32xf32, #tpu.memory_space<vmem>>, vector<1x8x32xf32>
      %127 = vector.shape_cast %126 : vector<1x8x32xf32> to vector<8x32xf32>
      %128 = arith.mulf %127, %127 : vector<8x32xf32>
      %cst_73 = arith.constant dense<0.000000e+00> : vector<8xf32>
      %129 = vector.multi_reduction <add>, %128, %cst_73 [1] : vector<8x32xf32> to vector<8xf32>
      %130 = vector.shape_cast %129 : vector<8xf32> to vector<8x1xf32>
      %cst_74 = arith.constant 3.200000e+01 : f32
      %131 = vector.broadcast %cst_74 : f32 to vector<8x1xf32>
      %132 = arith.divf %130, %131 : vector<8x1xf32>
      %cst_75 = arith.constant 9.99999997E-7 : f32
      %133 = vector.broadcast %cst_75 : f32 to vector<8x1xf32>
      %134 = arith.addf %132, %133 : vector<8x1xf32>
      %135 = math.rsqrt %134 : vector<8x1xf32>
      %136 = vector.broadcast %135 : vector<8x1xf32> to vector<8x32xf32>
      %137 = arith.mulf %127, %136 : vector<8x32xf32>
      %c0_76 = arith.constant 0 : index
      %c0_77 = arith.constant 0 : index
      %138 = vector.load %arg3[%c0_76, %c0_77] : memref<1x32xf32, #tpu.memory_space<vmem>>, vector<1x32xf32>
      %139 = vector.broadcast %138 : vector<1x32xf32> to vector<8x32xf32>
      %140 = arith.mulf %137, %139 : vector<8x32xf32>
      %141 = arith.truncf %140 : vector<8x32xf32> to vector<8x32xbf16>
      %c0_78 = arith.constant 0 : index
      %c0_79 = arith.constant 0 : index
      %142 = vector.load %arg7[%c0_78, %c0_79] : memref<32x64xbf16, #tpu.memory_space<vmem>>, vector<32x64xbf16>
      %cst_80 = arith.constant dense<0.000000e+00> : vector<8x64xf32>
      %143 = tpu.matmul %141, %142, %cst_80 {dimension_numbers = #tpu.dot_dimension_numbers<[1], [0], [0], [1], [0, 0, 1, 1], [], []>} : vector<8x32xbf16>, vector<32x64xbf16>, vector<8x64xf32> -> vector<8x64xf32>
      %c0_81 = arith.constant 0 : index
      %c0_82 = arith.constant 0 : index
      %144 = vector.load %arg8[%c0_81, %c0_82] : memref<1x64xf32, #tpu.memory_space<vmem>>, vector<1x64xf32>
      %145 = vector.broadcast %144 : vector<1x64xf32> to vector<8x64xf32>
      %146 = arith.addf %143, %145 : vector<8x64xf32>
      %147 = vector.extract_strided_slice %146 {offsets = [0, 0], sizes = [8, 32], strides = [1, 1]} : vector<8x64xf32> to vector<8x32xf32>
      %148 = tpu.transpose %147, [1, 0] : vector<8x32xf32> -> vector<32x8xf32>
      %149 = arith.truncf %148 : vector<32x8xf32> to vector<32x8xbf16>
      %c0_83 = arith.constant 0 : index
      %c0_84 = arith.constant 0 : index
      %150 = vector.load %arg16[%c0_83, %c0_84] : memref<32x8xbf16, #tpu.memory_space<vmem>>, vector<32x8xbf16>
      tpu.vector_store %arg16[%c0_83, %c0_84], %149 {strides = array<i32>} : memref<32x8xbf16, #tpu.memory_space<vmem>>, vector<32x8xbf16>,
      %151 = vector.extract_strided_slice %146 {offsets = [0, 32], sizes = [8, 32], strides = [1, 1]} : vector<8x64xf32> to vector<8x32xf32>
      %152 = arith.truncf %151 : vector<8x32xf32> to vector<8x32xbf16>
      %c0_85 = arith.constant 0 : index
      %c0_86 = arith.constant 0 : index
      %153 = vector.load %arg17[%c0_85, %c0_86] : memref<8x32xbf16, #tpu.memory_space<vmem>>, vector<8x32xbf16>
      tpu.vector_store %arg17[%c0_85, %c0_86], %152 {strides = array<i32>} : memref<8x32xbf16, #tpu.memory_space<vmem>>, vector<8x32xbf16>,
    } else {
    }
    %c8_i32 = arith.constant 8 : i32
    %3 = arith.muli %arg1, %c8_i32 : i32
    %4 = tpu.assume_multiple %3, 8 : i32
    %c0 = arith.constant 0 : index
    %5 = arith.index_cast %4 : i32 to index
    %c0_1 = arith.constant 0 : index
    %6 = vector.load %arg2[%c0, %5, %c0_1] : memref<1x8x32xf32, #tpu.memory_space<vmem>>, vector<1x8x32xf32>
    %7 = vector.shape_cast %6 : vector<1x8x32xf32> to vector<8x32xf32>
    %8 = arith.mulf %7, %7 : vector<8x32xf32>
    %cst = arith.constant dense<0.000000e+00> : vector<8xf32>
    %9 = vector.multi_reduction <add>, %8, %cst [1] : vector<8x32xf32> to vector<8xf32>
    %10 = vector.shape_cast %9 : vector<8xf32> to vector<8x1xf32>
    %cst_2 = arith.constant 3.200000e+01 : f32
    %11 = vector.broadcast %cst_2 : f32 to vector<8x1xf32>
    %12 = arith.divf %10, %11 : vector<8x1xf32>
    %cst_3 = arith.constant 9.99999997E-7 : f32
    %13 = vector.broadcast %cst_3 : f32 to vector<8x1xf32>
    %14 = arith.addf %12, %13 : vector<8x1xf32>
    %15 = math.rsqrt %14 : vector<8x1xf32>
    %16 = vector.broadcast %15 : vector<8x1xf32> to vector<8x32xf32>
    %17 = arith.mulf %7, %16 : vector<8x32xf32>
    %c0_4 = arith.constant 0 : index
    %c0_5 = arith.constant 0 : index
    %18 = vector.load %arg3[%c0_4, %c0_5] : memref<1x32xf32, #tpu.memory_space<vmem>>, vector<1x32xf32>
    %19 = vector.broadcast %18 : vector<1x32xf32> to vector<8x32xf32>
    %20 = arith.mulf %17, %19 : vector<8x32xf32>
    %21 = arith.truncf %20 : vector<8x32xf32> to vector<8x32xbf16>
    %c0_6 = arith.constant 0 : index
    %c0_7 = arith.constant 0 : index
    %22 = vector.load %arg4[%c0_6, %c0_7] : memref<1x32xf32, #tpu.memory_space<vmem>>, vector<1x32xf32>
    %23 = vector.broadcast %22 : vector<1x32xf32> to vector<8x32xf32>
    %24 = arith.mulf %17, %23 : vector<8x32xf32>
    %25 = arith.truncf %24 : vector<8x32xf32> to vector<8x32xbf16>
    %c0_8 = arith.constant 0 : index
    %c0_9 = arith.constant 0 : index
    %26 = vector.load %arg5[%c0_8, %c0_9] : memref<32x32xbf16, #tpu.memory_space<vmem>>, vector<32x32xbf16>
    %cst_10 = arith.constant dense<0.000000e+00> : vector<8x32xf32>
    %27 = tpu.matmul %21, %26, %cst_10 {dimension_numbers = #tpu.dot_dimension_numbers<[1], [0], [0], [1], [0, 0, 1, 1], [], []>} : vector<8x32xbf16>, vector<32x32xbf16>, vector<8x32xf32> -> vector<8x32xf32>
    %c0_11 = arith.constant 0 : index
    %c0_12 = arith.constant 0 : index
    %28 = vector.load %arg6[%c0_11, %c0_12] : memref<1x32xf32, #tpu.memory_space<vmem>>, vector<1x32xf32>
    %29 = vector.broadcast %28 : vector<1x32xf32> to vector<8x32xf32>
    %30 = arith.addf %27, %29 : vector<8x32xf32>
    %31 = arith.truncf %30 : vector<8x32xf32> to vector<8x32xbf16>
    %32 = vector.extract_strided_slice %31 {offsets = [0, 0], sizes = [8, 8], strides = [1, 1]} : vector<8x32xbf16> to vector<8x8xbf16>
    %c0_13 = arith.constant 0 : index
    %c0_14 = arith.constant 0 : index
    %33 = vector.load %arg16[%c0_13, %c0_14] : memref<32x8xbf16, #tpu.memory_space<vmem>>, vector<8x8xbf16>
    %cst_15 = arith.constant dense<0.000000e+00> : vector<8x8xf32>
    %34 = tpu.matmul %32, %33, %cst_15 {dimension_numbers = #tpu.dot_dimension_numbers<[1], [0], [0], [1], [0, 0, 1, 1], [], []>} : vector<8x8xbf16>, vector<8x8xbf16>, vector<8x8xf32> -> vector<8x8xf32>
    %cst_16 = arith.constant dense<0xFF800000> : vector<8xf32>
    %35 = vector.multi_reduction <maximumf>, %34, %cst_16 [1] : vector<8x8xf32> to vector<8xf32>
    %36 = vector.shape_cast %35 : vector<8xf32> to vector<8x1xf32>
    %37 = vector.broadcast %36 : vector<8x1xf32> to vector<8x8xf32>
    %38 = arith.subf %34, %37 : vector<8x8xf32>
    %39 = math.exp %38 : vector<8x8xf32>
    %cst_17 = arith.constant dense<0.000000e+00> : vector<8xf32>
    %40 = vector.multi_reduction <add>, %39, %cst_17 [1] : vector<8x8xf32> to vector<8xf32>
    %41 = vector.shape_cast %40 : vector<8xf32> to vector<8x1xf32>
    %42 = tpu.reciprocal %41 {approx = true} : vector<8x1xf32> -> vector<8x1xf32>
    %43 = vector.broadcast %42 : vector<8x1xf32> to vector<8x8xf32>
    %44 = arith.mulf %39, %43 : vector<8x8xf32>
    %45 = arith.truncf %44 : vector<8x8xf32> to vector<8x8xbf16>
    %c0_18 = arith.constant 0 : index
    %c0_19 = arith.constant 0 : index
    %46 = vector.load %arg17[%c0_18, %c0_19] : memref<8x32xbf16, #tpu.memory_space<vmem>>, vector<8x8xbf16>
    %cst_20 = arith.constant dense<0.000000e+00> : vector<8x8xf32>
    %47 = tpu.matmul %45, %46, %cst_20 {dimension_numbers = #tpu.dot_dimension_numbers<[1], [0], [0], [1], [0, 0, 1, 1], [], []>} : vector<8x8xbf16>, vector<8x8xbf16>, vector<8x8xf32> -> vector<8x8xf32>
    %48 = arith.truncf %47 : vector<8x8xf32> to vector<8x8xbf16>
    %c0_21 = arith.constant 0 : index
    %c0_22 = arith.constant 0 : index
    %49 = vector.load %arg18[%c0_21, %c0_22] : memref<8x32xbf16, #tpu.memory_space<vmem>>, vector<8x8xbf16>
    tpu.vector_store %arg18[%c0_21, %c0_22], %48 {strides = array<i32>} : memref<8x32xbf16, #tpu.memory_space<vmem>>, vector<8x8xbf16>,
    %50 = vector.extract_strided_slice %31 {offsets = [0, 8], sizes = [8, 8], strides = [1, 1]} : vector<8x32xbf16> to vector<8x8xbf16>
    %c8 = arith.constant 8 : index
    %c0_23 = arith.constant 0 : index
    %51 = vector.load %arg16[%c8, %c0_23] : memref<32x8xbf16, #tpu.memory_space<vmem>>, vector<8x8xbf16>
    %cst_24 = arith.constant dense<0.000000e+00> : vector<8x8xf32>
    %52 = tpu.matmul %50, %51, %cst_24 {dimension_numbers = #tpu.dot_dimension_numbers<[1], [0], [0], [1], [0, 0, 1, 1], [], []>} : vector<8x8xbf16>, vector<8x8xbf16>, vector<8x8xf32> -> vector<8x8xf32>
    %cst_25 = arith.constant dense<0xFF800000> : vector<8xf32>
    %53 = vector.multi_reduction <maximumf>, %52, %cst_25 [1] : vector<8x8xf32> to vector<8xf32>
    %54 = vector.shape_cast %53 : vector<8xf32> to vector<8x1xf32>
    %55 = vector.broadcast %54 : vector<8x1xf32> to vector<8x8xf32>
    %56 = arith.subf %52, %55 : vector<8x8xf32>
    %57 = math.exp %56 : vector<8x8xf32>
    %cst_26 = arith.constant dense<0.000000e+00> : vector<8xf32>
    %58 = vector.multi_reduction <add>, %57, %cst_26 [1] : vector<8x8xf32> to vector<8xf32>
    %59 = vector.shape_cast %58 : vector<8xf32> to vector<8x1xf32>
    %60 = tpu.reciprocal %59 {approx = true} : vector<8x1xf32> -> vector<8x1xf32>
    %61 = vector.broadcast %60 : vector<8x1xf32> to vector<8x8xf32>
    %62 = arith.mulf %57, %61 : vector<8x8xf32>
    %63 = arith.truncf %62 : vector<8x8xf32> to vector<8x8xbf16>
    %c0_27 = arith.constant 0 : index
    %c8_28 = arith.constant 8 : index
    %64 = vector.load %arg17[%c0_27, %c8_28] : memref<8x32xbf16, #tpu.memory_space<vmem>>, vector<8x8xbf16>
    %cst_29 = arith.constant dense<0.000000e+00> : vector<8x8xf32>
    %65 = tpu.matmul %63, %64, %cst_29 {dimension_numbers = #tpu.dot_dimension_numbers<[1], [0], [0], [1], [0, 0, 1, 1], [], []>} : vector<8x8xbf16>, vector<8x8xbf16>, vector<8x8xf32> -> vector<8x8xf32>
    %66 = arith.truncf %65 : vector<8x8xf32> to vector<8x8xbf16>
    %c0_30 = arith.constant 0 : index
    %c8_31 = arith.constant 8 : index
    %67 = vector.load %arg18[%c0_30, %c8_31] : memref<8x32xbf16, #tpu.memory_space<vmem>>, vector<8x8xbf16>
    tpu.vector_store %arg18[%c0_30, %c8_31], %66 {strides = array<i32>} : memref<8x32xbf16, #tpu.memory_space<vmem>>, vector<8x8xbf16>,
    %68 = vector.extract_strided_slice %31 {offsets = [0, 16], sizes = [8, 8], strides = [1, 1]} : vector<8x32xbf16> to vector<8x8xbf16>
    %c16 = arith.constant 16 : index
    %c0_32 = arith.constant 0 : index
    %69 = vector.load %arg16[%c16, %c0_32] : memref<32x8xbf16, #tpu.memory_space<vmem>>, vector<8x8xbf16>
    %cst_33 = arith.constant dense<0.000000e+00> : vector<8x8xf32>
    %70 = tpu.matmul %68, %69, %cst_33 {dimension_numbers = #tpu.dot_dimension_numbers<[1], [0], [0], [1], [0, 0, 1, 1], [], []>} : vector<8x8xbf16>, vector<8x8xbf16>, vector<8x8xf32> -> vector<8x8xf32>
    %cst_34 = arith.constant dense<0xFF800000> : vector<8xf32>
    %71 = vector.multi_reduction <maximumf>, %70, %cst_34 [1] : vector<8x8xf32> to vector<8xf32>
    %72 = vector.shape_cast %71 : vector<8xf32> to vector<8x1xf32>
    %73 = vector.broadcast %72 : vector<8x1xf32> to vector<8x8xf32>
    %74 = arith.subf %70, %73 : vector<8x8xf32>
    %75 = math.exp %74 : vector<8x8xf32>
    %cst_35 = arith.constant dense<0.000000e+00> : vector<8xf32>
    %76 = vector.multi_reduction <add>, %75, %cst_35 [1] : vector<8x8xf32> to vector<8xf32>
    %77 = vector.shape_cast %76 : vector<8xf32> to vector<8x1xf32>
    %78 = tpu.reciprocal %77 {approx = true} : vector<8x1xf32> -> vector<8x1xf32>
    %79 = vector.broadcast %78 : vector<8x1xf32> to vector<8x8xf32>
    %80 = arith.mulf %75, %79 : vector<8x8xf32>
    %81 = arith.truncf %80 : vector<8x8xf32> to vector<8x8xbf16>
    %c0_36 = arith.constant 0 : index
    %c16_37 = arith.constant 16 : index
    %82 = vector.load %arg17[%c0_36, %c16_37] : memref<8x32xbf16, #tpu.memory_space<vmem>>, vector<8x8xbf16>
    %cst_38 = arith.constant dense<0.000000e+00> : vector<8x8xf32>
    %83 = tpu.matmul %81, %82, %cst_38 {dimension_numbers = #tpu.dot_dimension_numbers<[1], [0], [0], [1], [0, 0, 1, 1], [], []>} : vector<8x8xbf16>, vector<8x8xbf16>, vector<8x8xf32> -> vector<8x8xf32>
    %84 = arith.truncf %83 : vector<8x8xf32> to vector<8x8xbf16>
    %c0_39 = arith.constant 0 : index
    %c16_40 = arith.constant 16 : index
    %85 = vector.load %arg18[%c0_39, %c16_40] : memref<8x32xbf16, #tpu.memory_space<vmem>>, vector<8x8xbf16>
    tpu.vector_store %arg18[%c0_39, %c16_40], %84 {strides = array<i32>} : memref<8x32xbf16, #tpu.memory_space<vmem>>, vector<8x8xbf16>,
    %86 = vector.extract_strided_slice %31 {offsets = [0, 24], sizes = [8, 8], strides = [1, 1]} : vector<8x32xbf16> to vector<8x8xbf16>
    %c24 = arith.constant 24 : index
    %c0_41 = arith.constant 0 : index
    %87 = vector.load %arg16[%c24, %c0_41] : memref<32x8xbf16, #tpu.memory_space<vmem>>, vector<8x8xbf16>
    %cst_42 = arith.constant dense<0.000000e+00> : vector<8x8xf32>
    %88 = tpu.matmul %86, %87, %cst_42 {dimension_numbers = #tpu.dot_dimension_numbers<[1], [0], [0], [1], [0, 0, 1, 1], [], []>} : vector<8x8xbf16>, vector<8x8xbf16>, vector<8x8xf32> -> vector<8x8xf32>
    %cst_43 = arith.constant dense<0xFF800000> : vector<8xf32>
    %89 = vector.multi_reduction <maximumf>, %88, %cst_43 [1] : vector<8x8xf32> to vector<8xf32>
    %90 = vector.shape_cast %89 : vector<8xf32> to vector<8x1xf32>
    %91 = vector.broadcast %90 : vector<8x1xf32> to vector<8x8xf32>
    %92 = arith.subf %88, %91 : vector<8x8xf32>
    %93 = math.exp %92 : vector<8x8xf32>
    %cst_44 = arith.constant dense<0.000000e+00> : vector<8xf32>
    %94 = vector.multi_reduction <add>, %93, %cst_44 [1] : vector<8x8xf32> to vector<8xf32>
    %95 = vector.shape_cast %94 : vector<8xf32> to vector<8x1xf32>
    %96 = tpu.reciprocal %95 {approx = true} : vector<8x1xf32> -> vector<8x1xf32>
    %97 = vector.broadcast %96 : vector<8x1xf32> to vector<8x8xf32>
    %98 = arith.mulf %93, %97 : vector<8x8xf32>
    %99 = arith.truncf %98 : vector<8x8xf32> to vector<8x8xbf16>
    %c0_45 = arith.constant 0 : index
    %c24_46 = arith.constant 24 : index
    %100 = vector.load %arg17[%c0_45, %c24_46] : memref<8x32xbf16, #tpu.memory_space<vmem>>, vector<8x8xbf16>
    %cst_47 = arith.constant dense<0.000000e+00> : vector<8x8xf32>
    %101 = tpu.matmul %99, %100, %cst_47 {dimension_numbers = #tpu.dot_dimension_numbers<[1], [0], [0], [1], [0, 0, 1, 1], [], []>} : vector<8x8xbf16>, vector<8x8xbf16>, vector<8x8xf32> -> vector<8x8xf32>
    %102 = arith.truncf %101 : vector<8x8xf32> to vector<8x8xbf16>
    %c0_48 = arith.constant 0 : index
    %c24_49 = arith.constant 24 : index
    %103 = vector.load %arg18[%c0_48, %c24_49] : memref<8x32xbf16, #tpu.memory_space<vmem>>, vector<8x8xbf16>
    tpu.vector_store %arg18[%c0_48, %c24_49], %102 {strides = array<i32>} : memref<8x32xbf16, #tpu.memory_space<vmem>>, vector<8x8xbf16>,
    %c0_50 = arith.constant 0 : index
    %c0_51 = arith.constant 0 : index
    %104 = vector.load %arg18[%c0_50, %c0_51] : memref<8x32xbf16, #tpu.memory_space<vmem>>, vector<8x32xbf16>
    %c0_52 = arith.constant 0 : index
    %c0_53 = arith.constant 0 : index
    %105 = vector.load %arg9[%c0_52, %c0_53] : memref<32x32xbf16, #tpu.memory_space<vmem>>, vector<32x32xbf16>
    %cst_54 = arith.constant dense<0.000000e+00> : vector<8x32xf32>
    %106 = tpu.matmul %104, %105, %cst_54 {dimension_numbers = #tpu.dot_dimension_numbers<[1], [0], [0], [1], [0, 0, 1, 1], [], []>} : vector<8x32xbf16>, vector<32x32xbf16>, vector<8x32xf32> -> vector<8x32xf32>
    %c0_55 = arith.constant 0 : index
    %c0_56 = arith.constant 0 : index
    %107 = vector.load %arg10[%c0_55, %c0_56] : memref<1x32xf32, #tpu.memory_space<vmem>>, vector<1x32xf32>
    %108 = vector.broadcast %107 : vector<1x32xf32> to vector<8x32xf32>
    %109 = arith.addf %106, %108 : vector<8x32xf32>
    %110 = arith.addf %109, %7 : vector<8x32xf32>
    %c0_57 = arith.constant 0 : index
    %c0_58 = arith.constant 0 : index
    %111 = vector.load %arg11[%c0_57, %c0_58] : memref<32x128xbf16, #tpu.memory_space<vmem>>, vector<32x128xbf16>
    %cst_59 = arith.constant dense<0.000000e+00> : vector<8x128xf32>
    %112 = tpu.matmul %25, %111, %cst_59 {dimension_numbers = #tpu.dot_dimension_numbers<[1], [0], [0], [1], [0, 0, 1, 1], [], []>} : vector<8x32xbf16>, vector<32x128xbf16>, vector<8x128xf32> -> vector<8x128xf32>
    %c0_60 = arith.constant 0 : index
    %c0_61 = arith.constant 0 : index
    %113 = vector.load %arg12[%c0_60, %c0_61] : memref<1x128xf32, #tpu.memory_space<vmem>>, vector<1x128xf32>
    %114 = vector.broadcast %113 : vector<1x128xf32> to vector<8x128xf32>
    %115 = arith.addf %112, %114 : vector<8x128xf32>
    %116 = arith.truncf %115 : vector<8x128xf32> to vector<8x128xbf16>
    %c0_62 = arith.constant 0 : index
    %c0_63 = arith.constant 0 : index
    %117 = vector.load %arg13[%c0_62, %c0_63] : memref<128x32xbf16, #tpu.memory_space<vmem>>, vector<128x32xbf16>
    %cst_64 = arith.constant dense<0.000000e+00> : vector<8x32xf32>
    %118 = tpu.matmul %116, %117, %cst_64 {dimension_numbers = #tpu.dot_dimension_numbers<[1], [0], [0], [1], [0, 0, 1, 1], [], []>} : vector<8x128xbf16>, vector<128x32xbf16>, vector<8x32xf32> -> vector<8x32xf32>
    %c0_65 = arith.constant 0 : index
    %c0_66 = arith.constant 0 : index
    %119 = vector.load %arg14[%c0_65, %c0_66] : memref<1x32xf32, #tpu.memory_space<vmem>>, vector<1x32xf32>
    %120 = vector.broadcast %119 : vector<1x32xf32> to vector<8x32xf32>
    %121 = arith.addf %118, %120 : vector<8x32xf32>
    %122 = arith.addf %121, %110 : vector<8x32xf32>
    %c0_67 = arith.constant 0 : index
    %c0_68 = arith.constant 0 : index
    %c0_69 = arith.constant 0 : index
    %123 = vector.load %arg15[%c0_67, %c0_68, %c0_69] : memref<1x8x32xf32, #tpu.memory_space<vmem>>, vector<1x8x32xf32>
    %124 = vector.shape_cast %123 : vector<1x8x32xf32> to vector<8x32xf32>
    %125 = vector.shape_cast %122 : vector<8x32xf32> to vector<1x8x32xf32>
    tpu.vector_store %arg15[%c0_67, %c0_68, %c0_69], %125 {strides = array<i32>} : memref<1x8x32xf32, #tpu.memory_space<vmem>>, vector<1x8x32xf32>,
    return
  }
  func.func @transform_0(%arg0: i32, %arg1: i32) -> (i32, i32, i32) {
    %c0_i32 = arith.constant 0 : i32
    %c0_i32_0 = arith.constant 0 : i32
    %c0_i32_1 = arith.constant 0 : i32
    return %arg0, %c0_i32, %c0_i32_0 : i32, i32, i32
  }
  func.func @transform_1(%arg0: i32, %arg1: i32) -> (i32, i32) {
    %c0_i32 = arith.constant 0 : i32
    %c0_i32_0 = arith.constant 0 : i32
    %c0_i32_1 = arith.constant 0 : i32
    return %c0_i32, %c0_i32_0 : i32, i32
  }
  func.func @transform_2(%arg0: i32, %arg1: i32) -> (i32, i32) {
    %c0_i32 = arith.constant 0 : i32
    %c0_i32_0 = arith.constant 0 : i32
    %c0_i32_1 = arith.constant 0 : i32
    return %c0_i32, %c0_i32_0 : i32, i32
  }
  func.func @transform_3(%arg0: i32, %arg1: i32) -> (i32, i32) {
    %c0_i32 = arith.constant 0 : i32
    %c0_i32_0 = arith.constant 0 : i32
    %c0_i32_1 = arith.constant 0 : i32
    return %c0_i32, %c0_i32_0 : i32, i32
  }
  func.func @transform_4(%arg0: i32, %arg1: i32) -> (i32, i32) {
    %c0_i32 = arith.constant 0 : i32
    %c0_i32_0 = arith.constant 0 : i32
    %c0_i32_1 = arith.constant 0 : i32
    return %c0_i32, %c0_i32_0 : i32, i32
  }
  func.func @transform_5(%arg0: i32, %arg1: i32) -> (i32, i32) {
    %c0_i32 = arith.constant 0 : i32
    %c0_i32_0 = arith.constant 0 : i32
    %c0_i32_1 = arith.constant 0 : i32
    return %c0_i32, %c0_i32_0 : i32, i32
  }
  func.func @transform_6(%arg0: i32, %arg1: i32) -> (i32, i32) {
    %c0_i32 = arith.constant 0 : i32
    %c0_i32_0 = arith.constant 0 : i32
    %c0_i32_1 = arith.constant 0 : i32
    return %c0_i32, %c0_i32_0 : i32, i32
  }
  func.func @transform_7(%arg0: i32, %arg1: i32) -> (i32, i32) {
    %c0_i32 = arith.constant 0 : i32
    %c0_i32_0 = arith.constant 0 : i32
    %c0_i32_1 = arith.constant 0 : i32
    return %c0_i32, %c0_i32_0 : i32, i32
  }
  func.func @transform_8(%arg0: i32, %arg1: i32) -> (i32, i32) {
    %c0_i32 = arith.constant 0 : i32
    %c0_i32_0 = arith.constant 0 : i32
    %c0_i32_1 = arith.constant 0 : i32
    return %c0_i32, %c0_i32_0 : i32, i32
  }
  func.func @transform_9(%arg0: i32, %arg1: i32) -> (i32, i32) {
    %c0_i32 = arith.constant 0 : i32
    %c0_i32_0 = arith.constant 0 : i32
    %c0_i32_1 = arith.constant 0 : i32
    return %c0_i32, %c0_i32_0 : i32, i32
  }
  func.func @transform_10(%arg0: i32, %arg1: i32) -> (i32, i32) {
    %c0_i32 = arith.constant 0 : i32
    %c0_i32_0 = arith.constant 0 : i32
    %c0_i32_1 = arith.constant 0 : i32
    return %c0_i32, %c0_i32_0 : i32, i32
  }
  func.func @transform_11(%arg0: i32, %arg1: i32) -> (i32, i32) {
    %c0_i32 = arith.constant 0 : i32
    %c0_i32_0 = arith.constant 0 : i32
    %c0_i32_1 = arith.constant 0 : i32
    return %c0_i32, %c0_i32_0 : i32, i32
  }
  func.func @transform_12(%arg0: i32, %arg1: i32) -> (i32, i32) {
    %c0_i32 = arith.constant 0 : i32
    %c0_i32_0 = arith.constant 0 : i32
    %c0_i32_1 = arith.constant 0 : i32
    return %c0_i32, %c0_i32_0 : i32, i32
  }
  func.func @transform_13(%arg0: i32, %arg1: i32) -> (i32, i32, i32) {
    %c0_i32 = arith.constant 0 : i32
    %c0_i32_0 = arith.constant 0 : i32
    return %arg0, %arg1, %c0_i32 : i32, i32, i32
  }
}

module attributes {stable_mosaic.version = 11 : i64} {
  func.func @_encoder_layer_kernel(%arg0: i32, %arg1: i32, %arg2: memref<1x8x32xf32, #tpu.memory_space<vmem>>, %arg3: memref<1x32xf32, #tpu.memory_space<vmem>>, %arg4: memref<1x32xf32, #tpu.memory_space<vmem>>, %arg5: memref<32x32xbf16, #tpu.memory_space<vmem>>, %arg6: memref<1x32xf32, #tpu.memory_space<vmem>>, %arg7: memref<32x64xbf16, #tpu.memory_space<vmem>>, %arg8: memref<1x64xf32, #tpu.memory_space<vmem>>, %arg9: memref<32x32xbf16, #tpu.memory_space<vmem>>, %arg10: memref<1x32xf32, #tpu.memory_space<vmem>>, %arg11: memref<32x128xbf16, #tpu.memory_space<vmem>>, %arg12: memref<1x128xf32, #tpu.memory_space<vmem>>, %arg13: memref<128x32xbf16, #tpu.memory_space<vmem>>, %arg14: memref<1x32xf32, #tpu.memory_space<vmem>>, %arg15: memref<1x8x32xf32, #tpu.memory_space<vmem>>, %arg16: memref<32x8xbf16, #tpu.memory_space<vmem>>, %arg17: memref<8x32xbf16, #tpu.memory_space<vmem>>, %arg18: memref<8x32xbf16, #tpu.memory_space<vmem>>) attributes {dimension_semantics = [#tpu.dimension_semantics<parallel>, #tpu.dimension_semantics<arbitrary>], iteration_bounds = array<i64: 2, 1>, scalar_prefetch = 0 : i64, scratch_operands = 3 : i64, tpu.core_type = #tpu.core_type<tc>, window_params = [{transform_indices = @transform_0, window_bounds = array<i64: 1, 8, 32>}, {pipeline_mode = #tpu.pipeline_mode<synchronous>, transform_indices = @transform_1, window_bounds = array<i64: 1, 32>}, {pipeline_mode = #tpu.pipeline_mode<synchronous>, transform_indices = @transform_2, window_bounds = array<i64: 1, 32>}, {pipeline_mode = #tpu.pipeline_mode<synchronous>, transform_indices = @transform_3, window_bounds = array<i64: 32, 32>}, {pipeline_mode = #tpu.pipeline_mode<synchronous>, transform_indices = @transform_4, window_bounds = array<i64: 1, 32>}, {pipeline_mode = #tpu.pipeline_mode<synchronous>, transform_indices = @transform_5, window_bounds = array<i64: 32, 64>}, {pipeline_mode = #tpu.pipeline_mode<synchronous>, transform_indices = @transform_6, window_bounds = array<i64: 1, 64>}, {pipeline_mode = #tpu.pipeline_mode<synchronous>, transform_indices = @transform_7, window_bounds = array<i64: 32, 32>}, {pipeline_mode = #tpu.pipeline_mode<synchronous>, transform_indices = @transform_8, window_bounds = array<i64: 1, 32>}, {pipeline_mode = #tpu.pipeline_mode<synchronous>, transform_indices = @transform_9, window_bounds = array<i64: 32, 128>}, {pipeline_mode = #tpu.pipeline_mode<synchronous>, transform_indices = @transform_10, window_bounds = array<i64: 1, 128>}, {pipeline_mode = #tpu.pipeline_mode<synchronous>, transform_indices = @transform_11, window_bounds = array<i64: 128, 32>}, {pipeline_mode = #tpu.pipeline_mode<synchronous>, transform_indices = @transform_12, window_bounds = array<i64: 1, 32>}, {transform_indices = @transform_13, window_bounds = array<i64: 1, 8, 32>}]} {
    %c0_i32 = arith.constant 0 : i32
    %0 = arith.cmpi eq, %arg1, %c0_i32 : i32
    %1 = arith.extui %0 : i1 to i32
    %c0_i32_0 = arith.constant 0 : i32
    %2 = arith.cmpi ne, %1, %c0_i32_0 : i32
    scf.if %2 {
      %c0_70 = arith.constant 0 : index
      %c0_71 = arith.constant 0 : index
      %c0_72 = arith.constant 0 : index
      %126 = vector.load %arg2[%c0_70, %c0_71, %c0_72] : memref<1x8x32xf32, #tpu.memory_space<vmem>>, vector<1x8x32xf32>
      %127 = vector.shape_cast %126 : vector<1x8x32xf32> to vector<8x32xf32>
      %128 = arith.mulf %127, %127 : vector<8x32xf32>
      %cst_73 = arith.constant dense<0.000000e+00> : vector<8xf32>
      %129 = vector.multi_reduction <add>, %128, %cst_73 [1] : vector<8x32xf32> to vector<8xf32>
      %130 = vector.shape_cast %129 : vector<8xf32> to vector<8x1xf32>
      %cst_74 = arith.constant 3.200000e+01 : f32
      %131 = vector.broadcast %cst_74 : f32 to vector<8x1xf32>
      %132 = arith.divf %130, %131 : vector<8x1xf32>
      %cst_75 = arith.constant 9.99999997E-7 : f32
      %133 = vector.broadcast %cst_75 : f32 to vector<8x1xf32>
      %134 = arith.addf %132, %133 : vector<8x1xf32>
      %135 = math.rsqrt %134 : vector<8x1xf32>
      %136 = vector.broadcast %135 : vector<8x1xf32> to vector<8x32xf32>
      %137 = arith.mulf %127, %136 : vector<8x32xf32>
      %c0_76 = arith.constant 0 : index
      %c0_77 = arith.constant 0 : index
      %138 = vector.load %arg3[%c0_76, %c0_77] : memref<1x32xf32, #tpu.memory_space<vmem>>, vector<1x32xf32>
      %139 = vector.broadcast %138 : vector<1x32xf32> to vector<8x32xf32>
      %140 = arith.mulf %137, %139 : vector<8x32xf32>
      %141 = arith.truncf %140 : vector<8x32xf32> to vector<8x32xbf16>
      %c0_78 = arith.constant 0 : index
      %c0_79 = arith.constant 0 : index
      %142 = vector.load %arg7[%c0_78, %c0_79] : memref<32x64xbf16, #tpu.memory_space<vmem>>, vector<32x64xbf16>
      %cst_80 = arith.constant dense<0.000000e+00> : vector<8x64xf32>
      %143 = tpu.matmul %141, %142, %cst_80 {dimension_numbers = #tpu.dot_dimension_numbers<[1], [0], [0], [1], [0, 0, 1, 1], [], []>} : vector<8x32xbf16>, vector<32x64xbf16>, vector<8x64xf32> -> vector<8x64xf32>
      %c0_81 = arith.constant 0 : index
      %c0_82 = arith.constant 0 : index
      %144 = vector.load %arg8[%c0_81, %c0_82] : memref<1x64xf32, #tpu.memory_space<vmem>>, vector<1x64xf32>
      %145 = vector.broadcast %144 : vector<1x64xf32> to vector<8x64xf32>
      %146 = arith.addf %143, %145 : vector<8x64xf32>
      %147 = vector.extract_strided_slice %146 {offsets = [0, 0], sizes = [8, 32], strides = [1, 1]} : vector<8x64xf32> to vector<8x32xf32>
      %148 = tpu.transpose %147, [1, 0] : vector<8x32xf32> -> vector<32x8xf32>
      %149 = arith.truncf %148 : vector<32x8xf32> to vector<32x8xbf16>
      %c0_83 = arith.constant 0 : index
      %c0_84 = arith.constant 0 : index
      %150 = vector.load %arg16[%c0_83, %c0_84] : memref<32x8xbf16, #tpu.memory_space<vmem>>, vector<32x8xbf16>
      tpu.vector_store %arg16[%c0_83, %c0_84], %149 {strides = array<i32>} : memref<32x8xbf16, #tpu.memory_space<vmem>>, vector<32x8xbf16>,
      %151 = vector.extract_strided_slice %146 {offsets = [0, 32], sizes = [8, 32], strides = [1, 1]} : vector<8x64xf32> to vector<8x32xf32>
      %152 = arith.truncf %151 : vector<8x32xf32> to vector<8x32xbf16>
      %c0_85 = arith.constant 0 : index
      %c0_86 = arith.constant 0 : index
      %153 = vector.load %arg17[%c0_85, %c0_86] : memref<8x32xbf16, #tpu.memory_space<vmem>>, vector<8x32xbf16>
      tpu.vector_store %arg17[%c0_85, %c0_86], %152 {strides = array<i32>} : memref<8x32xbf16, #tpu.memory_space<vmem>>, vector<8x32xbf16>,
    } else {
    }
    %c8_i32 = arith.constant 8 : i32
    %3 = arith.muli %arg1, %c8_i32 : i32
    %4 = tpu.assume_multiple %3, 8 : i32
    %c0 = arith.constant 0 : index
    %5 = arith.index_cast %4 : i32 to index
    %c0_1 = arith.constant 0 : index
    %6 = vector.load %arg2[%c0, %5, %c0_1] : memref<1x8x32xf32, #tpu.memory_space<vmem>>, vector<1x8x32xf32>
    %7 = vector.shape_cast %6 : vector<1x8x32xf32> to vector<8x32xf32>
    %8 = arith.mulf %7, %7 : vector<8x32xf32>
    %cst = arith.constant dense<0.000000e+00> : vector<8xf32>
    %9 = vector.multi_reduction <add>, %8, %cst [1] : vector<8x32xf32> to vector<8xf32>
    %10 = vector.shape_cast %9 : vector<8xf32> to vector<8x1xf32>
    %cst_2 = arith.constant 3.200000e+01 : f32
    %11 = vector.broadcast %cst_2 : f32 to vector<8x1xf32>
    %12 = arith.divf %10, %11 : vector<8x1xf32>
    %cst_3 = arith.constant 9.99999997E-7 : f32
    %13 = vector.broadcast %cst_3 : f32 to vector<8x1xf32>
    %14 = arith.addf %12, %13 : vector<8x1xf32>
    %15 = math.rsqrt %14 : vector<8x1xf32>
    %16 = vector.broadcast %15 : vector<8x1xf32> to vector<8x32xf32>
    %17 = arith.mulf %7, %16 : vector<8x32xf32>
    %c0_4 = arith.constant 0 : index
    %c0_5 = arith.constant 0 : index
    %18 = vector.load %arg3[%c0_4, %c0_5] : memref<1x32xf32, #tpu.memory_space<vmem>>, vector<1x32xf32>
    %19 = vector.broadcast %18 : vector<1x32xf32> to vector<8x32xf32>
    %20 = arith.mulf %17, %19 : vector<8x32xf32>
    %21 = arith.truncf %20 : vector<8x32xf32> to vector<8x32xbf16>
    %c0_6 = arith.constant 0 : index
    %c0_7 = arith.constant 0 : index
    %22 = vector.load %arg4[%c0_6, %c0_7] : memref<1x32xf32, #tpu.memory_space<vmem>>, vector<1x32xf32>
    %23 = vector.broadcast %22 : vector<1x32xf32> to vector<8x32xf32>
    %24 = arith.mulf %17, %23 : vector<8x32xf32>
    %25 = arith.truncf %24 : vector<8x32xf32> to vector<8x32xbf16>
    %c0_8 = arith.constant 0 : index
    %c0_9 = arith.constant 0 : index
    %26 = vector.load %arg5[%c0_8, %c0_9] : memref<32x32xbf16, #tpu.memory_space<vmem>>, vector<32x32xbf16>
    %cst_10 = arith.constant dense<0.000000e+00> : vector<8x32xf32>
    %27 = tpu.matmul %21, %26, %cst_10 {dimension_numbers = #tpu.dot_dimension_numbers<[1], [0], [0], [1], [0, 0, 1, 1], [], []>} : vector<8x32xbf16>, vector<32x32xbf16>, vector<8x32xf32> -> vector<8x32xf32>
    %c0_11 = arith.constant 0 : index
    %c0_12 = arith.constant 0 : index
    %28 = vector.load %arg6[%c0_11, %c0_12] : memref<1x32xf32, #tpu.memory_space<vmem>>, vector<1x32xf32>
    %29 = vector.broadcast %28 : vector<1x32xf32> to vector<8x32xf32>
    %30 = arith.addf %27, %29 : vector<8x32xf32>
    %31 = arith.truncf %30 : vector<8x32xf32> to vector<8x32xbf16>
    %32 = vector.extract_strided_slice %31 {offsets = [0, 0], sizes = [8, 8], strides = [1, 1]} : vector<8x32xbf16> to vector<8x8xbf16>
    %c0_13 = arith.constant 0 : index
    %c0_14 = arith.constant 0 : index
    %33 = vector.load %arg16[%c0_13, %c0_14] : memref<32x8xbf16, #tpu.memory_space<vmem>>, vector<8x8xbf16>
    %cst_15 = arith.constant dense<0.000000e+00> : vector<8x8xf32>
    %34 = tpu.matmul %32, %33, %cst_15 {dimension_numbers = #tpu.dot_dimension_numbers<[1], [0], [0], [1], [0, 0, 1, 1], [], []>} : vector<8x8xbf16>, vector<8x8xbf16>, vector<8x8xf32> -> vector<8x8xf32>
    %cst_16 = arith.constant dense<0xFF800000> : vector<8xf32>
    %35 = vector.multi_reduction <maximumf>, %34, %cst_16 [1] : vector<8x8xf32> to vector<8xf32>
    %36 = vector.shape_cast %35 : vector<8xf32> to vector<8x1xf32>
    %37 = vector.broadcast %36 : vector<8x1xf32> to vector<8x8xf32>
    %38 = arith.subf %34, %37 : vector<8x8xf32>
    %39 = math.exp %38 : vector<8x8xf32>
    %cst_17 = arith.constant dense<0.000000e+00> : vector<8xf32>
    %40 = vector.multi_reduction <add>, %39, %cst_17 [1] : vector<8x8xf32> to vector<8xf32>
    %41 = vector.shape_cast %40 : vector<8xf32> to vector<8x1xf32>
    %42 = tpu.reciprocal %41 {approx = true} : vector<8x1xf32> -> vector<8x1xf32>
    %43 = vector.broadcast %42 : vector<8x1xf32> to vector<8x8xf32>
    %44 = arith.mulf %39, %43 : vector<8x8xf32>
    %45 = arith.truncf %44 : vector<8x8xf32> to vector<8x8xbf16>
    %c0_18 = arith.constant 0 : index
    %c0_19 = arith.constant 0 : index
    %46 = vector.load %arg17[%c0_18, %c0_19] : memref<8x32xbf16, #tpu.memory_space<vmem>>, vector<8x8xbf16>
    %cst_20 = arith.constant dense<0.000000e+00> : vector<8x8xf32>
    %47 = tpu.matmul %45, %46, %cst_20 {dimension_numbers = #tpu.dot_dimension_numbers<[1], [0], [0], [1], [0, 0, 1, 1], [], []>} : vector<8x8xbf16>, vector<8x8xbf16>, vector<8x8xf32> -> vector<8x8xf32>
    %48 = arith.truncf %47 : vector<8x8xf32> to vector<8x8xbf16>
    %c0_21 = arith.constant 0 : index
    %c0_22 = arith.constant 0 : index
    %49 = vector.load %arg18[%c0_21, %c0_22] : memref<8x32xbf16, #tpu.memory_space<vmem>>, vector<8x8xbf16>
    tpu.vector_store %arg18[%c0_21, %c0_22], %48 {strides = array<i32>} : memref<8x32xbf16, #tpu.memory_space<vmem>>, vector<8x8xbf16>,
    %50 = vector.extract_strided_slice %31 {offsets = [0, 8], sizes = [8, 8], strides = [1, 1]} : vector<8x32xbf16> to vector<8x8xbf16>
    %c8 = arith.constant 8 : index
    %c0_23 = arith.constant 0 : index
    %51 = vector.load %arg16[%c8, %c0_23] : memref<32x8xbf16, #tpu.memory_space<vmem>>, vector<8x8xbf16>
    %cst_24 = arith.constant dense<0.000000e+00> : vector<8x8xf32>
    %52 = tpu.matmul %50, %51, %cst_24 {dimension_numbers = #tpu.dot_dimension_numbers<[1], [0], [0], [1], [0, 0, 1, 1], [], []>} : vector<8x8xbf16>, vector<8x8xbf16>, vector<8x8xf32> -> vector<8x8xf32>
    %cst_25 = arith.constant dense<0xFF800000> : vector<8xf32>
    %53 = vector.multi_reduction <maximumf>, %52, %cst_25 [1] : vector<8x8xf32> to vector<8xf32>
    %54 = vector.shape_cast %53 : vector<8xf32> to vector<8x1xf32>
    %55 = vector.broadcast %54 : vector<8x1xf32> to vector<8x8xf32>
    %56 = arith.subf %52, %55 : vector<8x8xf32>
    %57 = math.exp %56 : vector<8x8xf32>
    %cst_26 = arith.constant dense<0.000000e+00> : vector<8xf32>
    %58 = vector.multi_reduction <add>, %57, %cst_26 [1] : vector<8x8xf32> to vector<8xf32>
    %59 = vector.shape_cast %58 : vector<8xf32> to vector<8x1xf32>
    %60 = tpu.reciprocal %59 {approx = true} : vector<8x1xf32> -> vector<8x1xf32>
    %61 = vector.broadcast %60 : vector<8x1xf32> to vector<8x8xf32>
    %62 = arith.mulf %57, %61 : vector<8x8xf32>
    %63 = arith.truncf %62 : vector<8x8xf32> to vector<8x8xbf16>
    %c0_27 = arith.constant 0 : index
    %c8_28 = arith.constant 8 : index
    %64 = vector.load %arg17[%c0_27, %c8_28] : memref<8x32xbf16, #tpu.memory_space<vmem>>, vector<8x8xbf16>
    %cst_29 = arith.constant dense<0.000000e+00> : vector<8x8xf32>
    %65 = tpu.matmul %63, %64, %cst_29 {dimension_numbers = #tpu.dot_dimension_numbers<[1], [0], [0], [1], [0, 0, 1, 1], [], []>} : vector<8x8xbf16>, vector<8x8xbf16>, vector<8x8xf32> -> vector<8x8xf32>
    %66 = arith.truncf %65 : vector<8x8xf32> to vector<8x8xbf16>
    %c0_30 = arith.constant 0 : index
    %c8_31 = arith.constant 8 : index
    %67 = vector.load %arg18[%c0_30, %c8_31] : memref<8x32xbf16, #tpu.memory_space<vmem>>, vector<8x8xbf16>
    tpu.vector_store %arg18[%c0_30, %c8_31], %66 {strides = array<i32>} : memref<8x32xbf16, #tpu.memory_space<vmem>>, vector<8x8xbf16>,
    %68 = vector.extract_strided_slice %31 {offsets = [0, 16], sizes = [8, 8], strides = [1, 1]} : vector<8x32xbf16> to vector<8x8xbf16>
    %c16 = arith.constant 16 : index
    %c0_32 = arith.constant 0 : index
    %69 = vector.load %arg16[%c16, %c0_32] : memref<32x8xbf16, #tpu.memory_space<vmem>>, vector<8x8xbf16>
    %cst_33 = arith.constant dense<0.000000e+00> : vector<8x8xf32>
    %70 = tpu.matmul %68, %69, %cst_33 {dimension_numbers = #tpu.dot_dimension_numbers<[1], [0], [0], [1], [0, 0, 1, 1], [], []>} : vector<8x8xbf16>, vector<8x8xbf16>, vector<8x8xf32> -> vector<8x8xf32>
    %cst_34 = arith.constant dense<0xFF800000> : vector<8xf32>
    %71 = vector.multi_reduction <maximumf>, %70, %cst_34 [1] : vector<8x8xf32> to vector<8xf32>
    %72 = vector.shape_cast %71 : vector<8xf32> to vector<8x1xf32>
    %73 = vector.broadcast %72 : vector<8x1xf32> to vector<8x8xf32>
    %74 = arith.subf %70, %73 : vector<8x8xf32>
    %75 = math.exp %74 : vector<8x8xf32>
    %cst_35 = arith.constant dense<0.000000e+00> : vector<8xf32>
    %76 = vector.multi_reduction <add>, %75, %cst_35 [1] : vector<8x8xf32> to vector<8xf32>
    %77 = vector.shape_cast %76 : vector<8xf32> to vector<8x1xf32>
    %78 = tpu.reciprocal %77 {approx = true} : vector<8x1xf32> -> vector<8x1xf32>
    %79 = vector.broadcast %78 : vector<8x1xf32> to vector<8x8xf32>
    %80 = arith.mulf %75, %79 : vector<8x8xf32>
    %81 = arith.truncf %80 : vector<8x8xf32> to vector<8x8xbf16>
    %c0_36 = arith.constant 0 : index
    %c16_37 = arith.constant 16 : index
    %82 = vector.load %arg17[%c0_36, %c16_37] : memref<8x32xbf16, #tpu.memory_space<vmem>>, vector<8x8xbf16>
    %cst_38 = arith.constant dense<0.000000e+00> : vector<8x8xf32>
    %83 = tpu.matmul %81, %82, %cst_38 {dimension_numbers = #tpu.dot_dimension_numbers<[1], [0], [0], [1], [0, 0, 1, 1], [], []>} : vector<8x8xbf16>, vector<8x8xbf16>, vector<8x8xf32> -> vector<8x8xf32>
    %84 = arith.truncf %83 : vector<8x8xf32> to vector<8x8xbf16>
    %c0_39 = arith.constant 0 : index
    %c16_40 = arith.constant 16 : index
    %85 = vector.load %arg18[%c0_39, %c16_40] : memref<8x32xbf16, #tpu.memory_space<vmem>>, vector<8x8xbf16>
    tpu.vector_store %arg18[%c0_39, %c16_40], %84 {strides = array<i32>} : memref<8x32xbf16, #tpu.memory_space<vmem>>, vector<8x8xbf16>,
    %86 = vector.extract_strided_slice %31 {offsets = [0, 24], sizes = [8, 8], strides = [1, 1]} : vector<8x32xbf16> to vector<8x8xbf16>
    %c24 = arith.constant 24 : index
    %c0_41 = arith.constant 0 : index
    %87 = vector.load %arg16[%c24, %c0_41] : memref<32x8xbf16, #tpu.memory_space<vmem>>, vector<8x8xbf16>
    %cst_42 = arith.constant dense<0.000000e+00> : vector<8x8xf32>
    %88 = tpu.matmul %86, %87, %cst_42 {dimension_numbers = #tpu.dot_dimension_numbers<[1], [0], [0], [1], [0, 0, 1, 1], [], []>} : vector<8x8xbf16>, vector<8x8xbf16>, vector<8x8xf32> -> vector<8x8xf32>
    %cst_43 = arith.constant dense<0xFF800000> : vector<8xf32>
    %89 = vector.multi_reduction <maximumf>, %88, %cst_43 [1] : vector<8x8xf32> to vector<8xf32>
    %90 = vector.shape_cast %89 : vector<8xf32> to vector<8x1xf32>
    %91 = vector.broadcast %90 : vector<8x1xf32> to vector<8x8xf32>
    %92 = arith.subf %88, %91 : vector<8x8xf32>
    %93 = math.exp %92 : vector<8x8xf32>
    %cst_44 = arith.constant dense<0.000000e+00> : vector<8xf32>
    %94 = vector.multi_reduction <add>, %93, %cst_44 [1] : vector<8x8xf32> to vector<8xf32>
    %95 = vector.shape_cast %94 : vector<8xf32> to vector<8x1xf32>
    %96 = tpu.reciprocal %95 {approx = true} : vector<8x1xf32> -> vector<8x1xf32>
    %97 = vector.broadcast %96 : vector<8x1xf32> to vector<8x8xf32>
    %98 = arith.mulf %93, %97 : vector<8x8xf32>
    %99 = arith.truncf %98 : vector<8x8xf32> to vector<8x8xbf16>
    %c0_45 = arith.constant 0 : index
    %c24_46 = arith.constant 24 : index
    %100 = vector.load %arg17[%c0_45, %c24_46] : memref<8x32xbf16, #tpu.memory_space<vmem>>, vector<8x8xbf16>
    %cst_47 = arith.constant dense<0.000000e+00> : vector<8x8xf32>
    %101 = tpu.matmul %99, %100, %cst_47 {dimension_numbers = #tpu.dot_dimension_numbers<[1], [0], [0], [1], [0, 0, 1, 1], [], []>} : vector<8x8xbf16>, vector<8x8xbf16>, vector<8x8xf32> -> vector<8x8xf32>
    %102 = arith.truncf %101 : vector<8x8xf32> to vector<8x8xbf16>
    %c0_48 = arith.constant 0 : index
    %c24_49 = arith.constant 24 : index
    %103 = vector.load %arg18[%c0_48, %c24_49] : memref<8x32xbf16, #tpu.memory_space<vmem>>, vector<8x8xbf16>
    tpu.vector_store %arg18[%c0_48, %c24_49], %102 {strides = array<i32>} : memref<8x32xbf16, #tpu.memory_space<vmem>>, vector<8x8xbf16>,
    %c0_50 = arith.constant 0 : index
    %c0_51 = arith.constant 0 : index
    %104 = vector.load %arg18[%c0_50, %c0_51] : memref<8x32xbf16, #tpu.memory_space<vmem>>, vector<8x32xbf16>
    %c0_52 = arith.constant 0 : index
    %c0_53 = arith.constant 0 : index
    %105 = vector.load %arg9[%c0_52, %c0_53] : memref<32x32xbf16, #tpu.memory_space<vmem>>, vector<32x32xbf16>
    %cst_54 = arith.constant dense<0.000000e+00> : vector<8x32xf32>
    %106 = tpu.matmul %104, %105, %cst_54 {dimension_numbers = #tpu.dot_dimension_numbers<[1], [0], [0], [1], [0, 0, 1, 1], [], []>} : vector<8x32xbf16>, vector<32x32xbf16>, vector<8x32xf32> -> vector<8x32xf32>
    %c0_55 = arith.constant 0 : index
    %c0_56 = arith.constant 0 : index
    %107 = vector.load %arg10[%c0_55, %c0_56] : memref<1x32xf32, #tpu.memory_space<vmem>>, vector<1x32xf32>
    %108 = vector.broadcast %107 : vector<1x32xf32> to vector<8x32xf32>
    %109 = arith.addf %106, %108 : vector<8x32xf32>
    %110 = arith.addf %109, %7 : vector<8x32xf32>
    %c0_57 = arith.constant 0 : index
    %c0_58 = arith.constant 0 : index
    %111 = vector.load %arg11[%c0_57, %c0_58] : memref<32x128xbf16, #tpu.memory_space<vmem>>, vector<32x128xbf16>
    %cst_59 = arith.constant dense<0.000000e+00> : vector<8x128xf32>
    %112 = tpu.matmul %25, %111, %cst_59 {dimension_numbers = #tpu.dot_dimension_numbers<[1], [0], [0], [1], [0, 0, 1, 1], [], []>} : vector<8x32xbf16>, vector<32x128xbf16>, vector<8x128xf32> -> vector<8x128xf32>
    %c0_60 = arith.constant 0 : index
    %c0_61 = arith.constant 0 : index
    %113 = vector.load %arg12[%c0_60, %c0_61] : memref<1x128xf32, #tpu.memory_space<vmem>>, vector<1x128xf32>
    %114 = vector.broadcast %113 : vector<1x128xf32> to vector<8x128xf32>
    %115 = arith.addf %112, %114 : vector<8x128xf32>
    %116 = arith.truncf %115 : vector<8x128xf32> to vector<8x128xbf16>
    %c0_62 = arith.constant 0 : index
    %c0_63 = arith.constant 0 : index
    %117 = vector.load %arg13[%c0_62, %c0_63] : memref<128x32xbf16, #tpu.memory_space<vmem>>, vector<128x32xbf16>
    %cst_64 = arith.constant dense<0.000000e+00> : vector<8x32xf32>
    %118 = tpu.matmul %116, %117, %cst_64 {dimension_numbers = #tpu.dot_dimension_numbers<[1], [0], [0], [1], [0, 0, 1, 1], [], []>} : vector<8x128xbf16>, vector<128x32xbf16>, vector<8x32xf32> -> vector<8x32xf32>
    %c0_65 = arith.constant 0 : index
    %c0_66 = arith.constant 0 : index
    %119 = vector.load %arg14[%c0_65, %c0_66] : memref<1x32xf32, #tpu.memory_space<vmem>>, vector<1x32xf32>
    %120 = vector.broadcast %119 : vector<1x32xf32> to vector<8x32xf32>
    %121 = arith.addf %118, %120 : vector<8x32xf32>
    %122 = arith.addf %121, %110 : vector<8x32xf32>
    %c0_67 = arith.constant 0 : index
    %c0_68 = arith.constant 0 : index
    %c0_69 = arith.constant 0 : index
    %123 = vector.load %arg15[%c0_67, %c0_68, %c0_69] : memref<1x8x32xf32, #tpu.memory_space<vmem>>, vector<1x8x32xf32>
    %124 = vector.shape_cast %123 : vector<1x8x32xf32> to vector<8x32xf32>
    %125 = vector.shape_cast %122 : vector<8x32xf32> to vector<1x8x32xf32>
    tpu.vector_store %arg15[%c0_67, %c0_68, %c0_69], %125 {strides = array<i32>} : memref<1x8x32xf32, #tpu.memory_space<vmem>>, vector<1x8x32xf32>,
    return
  }
  func.func @transform_0(%arg0: i32, %arg1: i32) -> (i32, i32, i32) {
    %c0_i32 = arith.constant 0 : i32
    %c0_i32_0 = arith.constant 0 : i32
    %c0_i32_1 = arith.constant 0 : i32
    return %arg0, %c0_i32, %c0_i32_0 : i32, i32, i32
  }
  func.func @transform_1(%arg0: i32, %arg1: i32) -> (i32, i32) {
    %c0_i32 = arith.constant 0 : i32
    %c0_i32_0 = arith.constant 0 : i32
    %c0_i32_1 = arith.constant 0 : i32
    return %c0_i32, %c0_i32_0 : i32, i32
  }
  func.func @transform_2(%arg0: i32, %arg1: i32) -> (i32, i32) {
    %c0_i32 = arith.constant 0 : i32
    %c0_i32_0 = arith.constant 0 : i32
    %c0_i32_1 = arith.constant 0 : i32
    return %c0_i32, %c0_i32_0 : i32, i32
  }
  func.func @transform_3(%arg0: i32, %arg1: i32) -> (i32, i32) {
    %c0_i32 = arith.constant 0 : i32
    %c0_i32_0 = arith.constant 0 : i32
    %c0_i32_1 = arith.constant 0 : i32
    return %c0_i32, %c0_i32_0 : i32, i32
  }
  func.func @transform_4(%arg0: i32, %arg1: i32) -> (i32, i32) {
    %c0_i32 = arith.constant 0 : i32
    %c0_i32_0 = arith.constant 0 : i32
    %c0_i32_1 = arith.constant 0 : i32
    return %c0_i32, %c0_i32_0 : i32, i32
  }
  func.func @transform_5(%arg0: i32, %arg1: i32) -> (i32, i32) {
    %c0_i32 = arith.constant 0 : i32
    %c0_i32_0 = arith.constant 0 : i32
    %c0_i32_1 = arith.constant 0 : i32
    return %c0_i32, %c0_i32_0 : i32, i32
  }
  func.func @transform_6(%arg0: i32, %arg1: i32) -> (i32, i32) {
    %c0_i32 = arith.constant 0 : i32
    %c0_i32_0 = arith.constant 0 : i32
    %c0_i32_1 = arith.constant 0 : i32
    return %c0_i32, %c0_i32_0 : i32, i32
  }
  func.func @transform_7(%arg0: i32, %arg1: i32) -> (i32, i32) {
    %c0_i32 = arith.constant 0 : i32
    %c0_i32_0 = arith.constant 0 : i32
    %c0_i32_1 = arith.constant 0 : i32
    return %c0_i32, %c0_i32_0 : i32, i32
  }
  func.func @transform_8(%arg0: i32, %arg1: i32) -> (i32, i32) {
    %c0_i32 = arith.constant 0 : i32
    %c0_i32_0 = arith.constant 0 : i32
    %c0_i32_1 = arith.constant 0 : i32
    return %c0_i32, %c0_i32_0 : i32, i32
  }
  func.func @transform_9(%arg0: i32, %arg1: i32) -> (i32, i32) {
    %c0_i32 = arith.constant 0 : i32
    %c0_i32_0 = arith.constant 0 : i32
    %c0_i32_1 = arith.constant 0 : i32
    return %c0_i32, %c0_i32_0 : i32, i32
  }
  func.func @transform_10(%arg0: i32, %arg1: i32) -> (i32, i32) {
    %c0_i32 = arith.constant 0 : i32
    %c0_i32_0 = arith.constant 0 : i32
    %c0_i32_1 = arith.constant 0 : i32
    return %c0_i32, %c0_i32_0 : i32, i32
  }
  func.func @transform_11(%arg0: i32, %arg1: i32) -> (i32, i32) {
    %c0_i32 = arith.constant 0 : i32
    %c0_i32_0 = arith.constant 0 : i32
    %c0_i32_1 = arith.constant 0 : i32
    return %c0_i32, %c0_i32_0 : i32, i32
  }
  func.func @transform_12(%arg0: i32, %arg1: i32) -> (i32, i32) {
    %c0_i32 = arith.constant 0 : i32
    %c0_i32_0 = arith.constant 0 : i32
    %c0_i32_1 = arith.constant 0 : i32
    return %c0_i32, %c0_i32_0 : i32, i32
  }
  func.func @transform_13(%arg0: i32, %arg1: i32) -> (i32, i32, i32) {
    %c0_i32 = arith.constant 0 : i32
    %c0_i32_0 = arith.constant 0 : i32
    return %arg0, %arg1, %c0_i32 : i32, i32, i32
  }
}

</mosaic_0001>

<bundles_post_ra>
// kernel: tpu_custom_call.1
= control target key start
LH: loop header
LB: loop body
LE: loop exit
PB: predicated region body
PF: predicated region fallthrough
CT: control target
= control target key end

     0   :  { %18 = vsyncpa [#allocation6], 0  ;;  %s2436_s0 = inlined_call_operand.vmem [shape: f32[2,8,32], index: 0, kind: input, shape index: {}]   ;;  %s2437_s1 = inlined_call_operand.vmem [shape: f32[1,32], index: 1, kind: input, shape index: {}]   ;;  %s2438_s2 = inlined_call_operand.vmem [shape: f32[1,32], index: 2, kind: input, shape index: {}]   ;;  %s2439_s3 = inlined_call_operand.vmem [shape: bf16[32,32], index: 3, kind: input, shape index: {}]   ;;  %s2440_s4 = inlined_call_operand.vmem [shape: f32[1,32], index: 4, kind: input, shape index: {}]   ;;  %s2441_s5 = inlined_call_operand.vmem [shape: bf16[32,64], index: 5, kind: input, shape index: {}]   ;;  %s2442_s6 = inlined_call_operand.vmem [shape: f32[1,64], index: 6, kind: input, shape index: {}]   ;;  %s2443_s7 = inlined_call_operand.vmem [shape: bf16[32,32], index: 7, kind: input, shape index: {}]   ;;  %s2444_s8 = inlined_call_operand.hbm [shape: f32[1,32], index: 8, kind: input, shape index: {}]   ;;  %s2445_s9 = inlined_call_operand.vmem [shape: bf16[32,128], index: 9, kind: input, shape index: {}]   ;;  %s2446_s10 = inlined_call_operand.hbm [shape: f32[1,128], index: 10, kind: input, shape index: {}]   ;;  %s2447_s11 = inlined_call_operand.vmem [shape: bf16[128,32], index: 11, kind: input, shape index: {}]   ;;  %s2448_s12 = inlined_call_operand.vmem [shape: f32[1,32], index: 12, kind: input, shape index: {}]   ;;  %s2449_s13 = inlined_call_operand.hbm [shape: f32[2,8,32], index: 13, kind: output, shape index: {}]  }
   0x1   :  { %19 = vsyncpa [#allocation9], 0 }
   0x2   :  { %20 = vsyncpa [#allocation7], 0 }
   0x3   :  { %22 = vsyncpa [#allocation7 + $0x1], 0  ;;  %s2111_s25 = smov 0   ;;  %s2113_s26 = smov 0  }
   0x4   :  { %s2115_s27 = smov 0   ;;  %s2117_s28 = smov 0  }
   0x5   :  { %s2119_s29 = smov 0   ;;  %s2121_s30 = smov 0  }
   0x6 LB: > { %2456 = sst [smem:[#allocation14_spill]] %s2015_s27  ;;  %s1560_s14 = sadd.s32 4294967295, %s2027_s30   ;;  %s2027_s30 = sphi %s2121_s30, %s28_s30   ;;  %s2023_s29 = sphi %s2119_s29, %s2471_s29   ;;  %s2019_s28 = sphi %s2117_s28, %s2470_s28   ;;  %s2015_s27 = sphi %s2115_s27, %s2469_s27   ;;  %s2011_s26 = sphi %s2113_s26, %s2473_s26   ;;  %s2007_s25 = sphi %s2111_s25, %s2472_s25  }
   0x7   : > { %2457 = sst [smem:[#allocation15_spill]] %s2023_s29  ;;  %s1561_s15 = sadd.s32 4294967294, %s2027_s30  }
   0x8   : > { %s40_s16 = sadd.s32 1, %s2023_s29  ;;  %s327_s17 = sadd.s32 1, %s2015_s27 }
   0x9   : > { %p42_p0 = scmp.ge.s32.totalorder %s40_s16, 2  ;;  %p337_p1 = scmp.ne.s32.totalorder %s2015_s27, %s2011_s26 }
   0xa   : > { %p338_p2 = scmp.eq.s32.totalorder %s1560_s14, 1  ;;  %p343_p3 = scmp.ne.s32.totalorder %s2011_s26, %s2007_s25 }
   0xb   : > { %s2475_s16 = smov (%p42_p0, %s40_s16), 0  ;;  %p344_p5 = scmp.eq.s32.totalorder %s1561_s15, 1 }
   0xc   : > { %2458 = sst [smem:[#allocation16_spill]] %s2475_s16  ;;  %p2151_p4 = por %p338_p2, %p337_p1 }
   0xd   : > { %s322_s19 = ssub.s32 %s2023_s29, %s2475_s16  ;;  %p1562_p6 = scmp.ge.s32.totalorder %s2027_s30, 1 }
   0xe   : > { %s2459_s18 = scalar_select %p2151_p4, 1, 0 }
   0xf   : > { %p325_p7 = scmp.eq.s32.totalorder %s322_s19, 0  ;;  %p2158_p8 = por %p344_p5, %p343_p3 }
  0x10   : > { %p351_p9 = scmp.lt.s32.totalorder %s2027_s30, 3  ;;  %p2170_p11 = scmp.eq.s32.totalorder %s1560_s14, 0 }
  0x11   : > { %s2460_s20 = scalar_select %p2158_p8, 1, 0 }
  0x12   : > { %s2164_s21 = scalar_select %p325_p7, %s2015_s27, %s327_s17  }
  0x13   : > { %p2166_p10 = pnand %p1562_p6, %p351_p9  ;;  %s2029_s24 = smov [#allocation5]  }
  0x14   : > { %2461 = sst [smem:[#allocation17_spill]] %s2164_s21  ;;  %s385_s15 = sshll.u32 %s2029_s24, 4  ;;  %s386_s15 = int_to_ptr.vmem [resolvable:$true] %s385_s15 }
  0x15   : > { %s2463_s23 = scalar_select %p2170_p11, 1, 0 }
  0x16   : > { %p1777_p12 = pneg %p2166_p10  ;;  %s2030_s19 = smov [#allocation8]  }
  0x17   : > { %s399_s16 = sshll.u32 %s2030_s19, 4  ;;  %s1902_s14 = scalar_lea.vmem %s386_s15, 16  ;;  %s400_s16 = int_to_ptr.vmem [resolvable:$true] %s399_s16 }
  0x18   : > { %p2178_p13 = pnand %p2170_p11, %p1777_p12  ;;  %p1903_p1 = scmp.ne.s32.totalorder %s386_s15, %s1902_s14 }
  0x19   : > { %s1909_s24 = scalar_lea.vmem %s386_s15, 32  ;;  %p1910_p5 = scmp.lt.s32.totalorder %s386_s15, %s386_s15 }
  0x1a   : > { %p1893_p0 = pneg %p2178_p13  ;;  %p1911_p6 = scmp.lt.s32.totalorder %s1909_s24, %s1902_s14 }
  0x1c   : > { %p1905_p2 = pnand %p1903_p1, %p1893_p0  ;;  %p1912_p7 = por %p1911_p6, %p1910_p5 }
  0x1e   : > { %p1906_p3 = pneg %p1905_p2 }
  0x20   : > { %p1913_p9 = pnand %p1912_p7, %p1906_p3 }
  0x22   : > { %1916 = shalt.err (!%p1913_p9)
}
  0x23   : > { %1780 = dma.hbm_to_vmem [thread:$0]  (!%p2178_p13), %s2444_s8, 16, %s386_s15, [#allocation6]  }
  0x24   : > { %s1928_s21 = scalar_lea.vmem %s400_s16, 16  ;;  %s1935_s27 = scalar_lea.vmem %s400_s16, 32 }
  0x25   : > { %p1929_p12 = scmp.ne.s32.totalorder %s400_s16, %s1928_s21  ;;  %p1936_p2 = scmp.lt.s32.totalorder %s400_s16, %s400_s16 }
  0x26   : > { %p1937_p4 = scmp.lt.s32.totalorder %s1935_s27, %s1928_s21 }
  0x27   : > { %p1931_p8 = pnand %p1929_p12, %p1893_p0 }
  0x28   : > { %p1938_p11 = por %p1937_p4, %p1936_p2 }
  0x29   : > { %p1932_p1 = pneg %p1931_p8 }
  0x2b   : > { %p1939_p5 = pnand %p1938_p11, %p1932_p1 }
  0x2d   : > { %1942 = shalt.err (!%p1939_p5)
}
  0x2e   : > { %1783 = dma.hbm_to_vmem [thread:$0]  (!%p2178_p13), %s2446_s10, 16, %s400_s16, [#allocation9]  }
  0x2f   : > { %425 = sbr.rel (%p2166_p10) target bundleno = 1746 (0x6d2), region = 72  ;;  %p2465_p3 = scmp.ne.s32.totalorder (!%p2166_p10), %s2463_s23, 0 }
  0x34   : > { %1994 = dma.done.wait (%p2465_p3), [#allocation6], 16  }
  0x35   : > { %1996 = vsyncadd (%p2465_p3), [#allocation6], 4294967280 }
  0x36   : > { %1998 = dma.done.wait (%p2465_p3), [#allocation9], 16  }
  0x37   : > { %2000 = vsyncadd (%p2465_p3), [#allocation9], 4294967280  ;;  %p472_p4 = scmp.lt.s32.totalorder %s2019_s28, 1  ;;  %vm483_vm0 = vcmask 261120   ;;  %v1852_v3 = vld [vmem:[%s2441_s5 + $0x8] sm:$0xff]   ;;  %v2031_v4 = vmov 0.0  }
  0x38   : > { %1667 = vmatprep.subr.bf16.mxu1 %v2031_v4  ;;  %vm2032_vm1 = vmmov 0   ;;  %v1853_v5 = vld [vmem:[%s2441_s5] sm:$0xff]   ;;  %1695 = vmatprep.subr.bf16.mxu0 %v2031_v4  ;;  %v1854_v17 = vld [vmem:[%s2439_s3 + $0x8] sm:$0xff]   ;;  %s2033_s15 = smov 112   ;;  %s2034_s17 = smov 120   ;;  %vm615_vm2 = vcmask 60416  }
  0x39   : > { %s473_s27 = scalar_select %p472_p4, %s2019_s28, 1  ;;  %1671 = vmatprep.mubr.msk.bf16.mxu1 %vm2032_vm1, %v2031_v4  ;;  %1668 = vmatpush3.bf16.msra.mxu1 %v1852_v3  ;;  %v1571_v13 = vld [vmem:[%s2437_s1] ss:$0 sm:$0xff]  ;;  %vm732_vm3 = vcmask 1043456   ;;  %vm728_vm4 = vcmask 64512   ;;  %vm627_vm5 = vcmask 257024  }
  0x3a   : > { %1669 = vmatprep.subr.bf16.mxu1 %v2031_v4  ;;  %1697 = vmatprep.mubr.msk.bf16.mxu0 %vm2032_vm1, %v2031_v4  ;;  %v1855_v21 = vld [vmem:[%s2439_s3] sm:$0xff]   ;;  %s2035_s19 = smov 104   ;;  %s2039_s16 = smov 24   ;;  %vm959_vm6 = vcmask 126016   ;;  %vm1081_vm7 = vcmask 191616   ;;  %vm1203_vm8 = vcmask 257216  }
  0x3b   : > { %s1570_s29 = sshll.u32 %s473_s27, 3  ;;  %v1583_v27 = vld [vmem:[%s2440_s4] ss:$0 sm:$0xff]  ;;  %s2036_s27 = smov 96  }
  0x3c   : > { %s475_s22 = scalar_lea.vmem %s2436_s0, %s1570_s29  ;;  %v1572_v34 = vld [vmem:[%s2442_s6] ss:$0 sm:$0xff]  ;;  %s2038_s29 = smov 16  }
  0x3d   : > { %v2215_v0 = vld [vmem:[%s475_s22] sm:$0xff]  ;;  %1670 = vmatpush3.bf16.msra.mxu1 %v1853_v5  ;;  %p2466_p10 = scmp.ne.s32.totalorder %s2459_s18, 0 }
  0x3e   : > { %v482_v1 = vmul.f32 %v2215_v0, %v2215_v0  ;;  %1675 = vmatprep.subr.bf16.mxu1 %v2031_v4 }
  0x40   : > { %v484_v2 = vsel %vm483_vm0, %v482_v1, 0.0 }
  0x41   : > { %485 = vadd.xlane.f32.xlu0 %v484_v2 }
  0x45   : > { %635 = vadd.xlane.f32.xlu0 %v484_v2 }
  0xca   : > { %v486_v6 = vpop.xlane.xlu0 %485 }
  0xcb   : > { %v488_v7 = vmul.f32 0.03125, %v486_v6 }
  0xcd   : > { %v489_v8 = vadd.f32 1e-06, %v488_v7 }
  0xce   : > { %v636_v9 = vpop.xlane.xlu0 %635 }
  0xcf   : > { %1871 = vrsqrt.f32 %v489_v8  ;;  %v638_v10 = vmul.f32 0.03125, %v636_v9 }
  0xd1   : > { %v639_v11 = vadd.f32 1e-06, %v638_v10 }
  0xd3   : > { %1873 = vrsqrt.f32 %v639_v11 }
  0xdc   : > { %v1872_v12 = vpop.eup %1871 }
  0xdd   : > { %v491_v14 = vmul.f32 %v1872_v12, %v2215_v0 }
  0xdf   : > { %v499_v15 = vmul.f32 %v1571_v13, %v491_v14 }
  0xe0   : > { %v1874_v16 = vpop.eup %1873 }
  0xe1   : > { %v500_v18 = vpack.c.bf16 %v499_v15, %v499_v15  ;;  %v2242_v19 = vmul.f32 %v1874_v16, %v2215_v0 }
  0xe3   : > { %1672 = vmatmul.mubr.msk.bf16.vlgmr.msra.gmra.mxu1 %vm483_vm0, %v500_v18  ;;  %v649_v20 = vmul.f32 %v1571_v13, %v2242_v19 }
  0xe4   : > { %1676 = vmatpush3.bf16.msra.mxu1 %v1854_v17  ;;  %1679 = vmatprep.mubr.msk.bf16.mxu1 %vm2032_vm1, %v2031_v4 }
  0xe5   : > { %1677 = vmatprep.subr.bf16.mxu1 %v2031_v4  ;;  %v650_v22 = vpack.c.bf16 %v649_v20, %v649_v20 }
  0xe8   : > { %1678 = vmatpush3.bf16.msra.mxu1 %v1855_v21 }
  0xe9   : > { %1683 = vmatprep.subr.bf16.mxu1 %v2031_v4 }
  0xeb   : > { %1680 = vmatmul.mubr.msk.bf16.vlgmr.msra.gmra.mxu1 %vm483_vm0, %v650_v22 }
  0xec   : > { %1685 = vmatprep.mubr.msk.bf16.mxu1 %vm2032_vm1, %v2031_v4 }
 0x1a3   : > { %v561_v23 = vpop.f32.mrf.mxu1 }
 0x1a4   : > { %v2265_v35 = vadd.f32 %v1572_v34, %v561_v23 }
 0x1a5   : > { %v1673_v24 = vpop.f32.mrf.mxu1 }
 0x1a6   : > { %v1626_v13 = vpack.c.bf16 %v2265_v35, %v2265_v35 }
 0x1a7   : > { %v564_v25 = vpop.f32.mrf.mxu1 }
 0x1a9   : > { %v1674_v26 = vpop.f32.mrf.mxu1 }
 0x1ab   : > { %v720_v28 = vpop.f32.mrf.mxu1 }
 0x1ac   : > { %v721_v29 = vadd.f32 %v1583_v27, %v720_v28 }
 0x1ad   : > { %v1681_v30 = vpop.f32.mrf.mxu1 }
 0x1ae   : > { %v726_v31 = vpack.c.bf16 %v721_v29, %v721_v29 }
 0x1af   : > { %v723_v32 = vpop.f32.mrf.mxu1 }
 0x1b0   : > { %962 = vrot.lane.b32.xlu0 %v726_v31, %s2033_s15  ;;  %840 = vrot.lane.b32.xlu1 %v726_v31, %s2034_s17 }
 0x1b1   : > { %v1682_v33 = vpop.f32.mrf.mxu1 }
 0x1b4   : > { %1084 = vrot.lane.b32.xlu0 %v726_v31, %s2035_s19 }
 0x1d9   : > { %567 = vxpose.xlu1.b32.start.end [1/1] (short) (narrow) %v2265_v35, 32 }
 0x222   : > { %v841_v36 = vpop.permute.xlu1 %840  ;;  %v963_v53 = vpop.permute.xlu0 %962 }
 0x226   : > { %v1085_v54 = vpop.permute.xlu0 %1084 }
 0x255   : > { %v583_v37 = vpop.trf.xlu1 }
 0x256   : > { %v1622_v38 = vpack.c.bf16 %v583_v37, %v583_v37 }
 0x258   : > { %616 = vst.msk [vmem:[#allocation2] sm:$0xf] %vm615_vm2, %v1622_v38 }
 0x259   : > { %v584_v39 = vpop.trf.xlu1 }
 0x25a   : > { %v1623_v40 = vpack.c.bf16 %v584_v39, %v584_v39 }
 0x25c   : > { %617 = vst.msk [vmem:[#allocation2 + $0x4] sm:$0xf] %vm615_vm2, %v1623_v40 }
 0x25d   : > { %v585_v41 = vpop.trf.xlu1 }
 0x25e   : > { %v1624_v42 = vpack.c.bf16 %v585_v41, %v585_v41 }
 0x25f   : > { %v727_v43 = vld [vmem:[#allocation2] sm:$0xf] }
 0x260   : > { %618 = vst.msk [vmem:[#allocation2 + $0x8] sm:$0xf] %vm615_vm2, %v1624_v42  ;;  %v734_v44 = vsel %vm732_vm3, %v727_v43, 0 }
 0x261   : > { %1684 = vmatpush3.bf16.msra.mxu1 %v734_v44  ;;  %v586_v45 = vpop.trf.xlu1 }
 0x262   : > { %v1625_v46 = vpack.c.bf16 %v586_v45, %v586_v45  ;;  %1689 = vmatprep.subr.bf16.mxu1 %v2031_v4 }
 0x263   : > { %v838_v47 = vld [vmem:[#allocation2 + $0x4] sm:$0xf] }
 0x264   : > { %1686 = vmatmul.mubr.msk.bf16.vlgmr.msra.gmra.mxu1 %vm728_vm4, %v726_v31  ;;  %v846_v48 = vsel %vm732_vm3, %v838_v47, 0  ;;  %619 = vst.msk [vmem:[#allocation2 + $0xc] sm:$0xf] %vm615_vm2, %v1625_v46 }
 0x265   : > { %1696 = vmatpush3.bf16.msra.mxu0 %v846_v48  ;;  %1691 = vmatprep.mubr.msk.bf16.mxu1 %vm2032_vm1, %v2031_v4 }
 0x266   : > { %1707 = vmatprep.subr.bf16.mxu0 %v2031_v4 }
 0x267   : > { %v961_v49 = vld [vmem:[#allocation2 + $0x8] sm:$0xf] }
 0x268   : > { %1698 = vmatmul.mubr.msk.bf16.vlgmr.msra.gmra.mxu0 %vm728_vm4, %v841_v36  ;;  %v968_v50 = vsel %vm732_vm3, %v961_v49, 0 }
 0x269   : > { %1708 = vmatpush3.bf16.msra.mxu0 %v968_v50  ;;  %1709 = vmatprep.mubr.msk.bf16.mxu0 %vm2032_vm1, %v2031_v4 }
 0x26a   : > { %1719 = vmatprep.subr.bf16.mxu0 %v2031_v4 }
 0x26b   : > { %v1083_v51 = vld [vmem:[#allocation2 + $0xc] sm:$0xf] }
 0x26c   : > { %v1090_v52 = vsel %vm732_vm3, %v1083_v51, 0 }
 0x270   : > { %1710 = vmatmul.mubr.msk.bf16.vlgmr.msra.gmra.mxu0 %vm728_vm4, %v963_v53 }
 0x271   : > { %1720 = vmatpush3.bf16.msra.mxu0 %v1090_v52  ;;  %1721 = vmatprep.mubr.msk.bf16.mxu0 %vm2032_vm1, %v2031_v4 }
 0x272   : > { %1731 = vmatprep.subr.bf16.mxu0 %v2031_v4 }
 0x278   : > { %1722 = vmatmul.mubr.msk.bf16.vlgmr.msra.gmra.mxu0 %vm728_vm4, %v1085_v54 }
 0x279   : > { %1735 = vmatprep.mubr.msk.bf16.mxu0 %vm2032_vm1, %v2031_v4 }
 0x324   : > { %v770_v55 = vpop.f32.mrf.mxu1 }
 0x325   : > { %v776_v56 = vsel %vm728_vm4, %v770_v55, -inf }
 0x326   : > { %777 = vmax.xlane.f32.xlu0 %v776_v56  ;;  %v1687_v57 = vpop.f32.mrf.mxu1 }
 0x328   : > { %v773_v58 = vpop.f32.mrf.mxu1  ;;  %v882_v59 = vpop.f32.mrf.mxu0 }
 0x329   : > { %v888_v60 = vsel %vm728_vm4, %v882_v59, -inf }
 0x32a   : > { %889 = vmax.xlane.f32.xlu1 %v888_v60  ;;  %v1688_v61 = vpop.f32.mrf.mxu1  ;;  %v1699_v62 = vpop.f32.mrf.mxu0 }
 0x32b   : > { %v1859_v62 = vld [vmem:[%s2445_s9 + $0x8] sm:$0xff]  }
 0x32c   : > { %v885_v63 = vpop.f32.mrf.mxu0 }
 0x32e   : > { %v1700_v1 = vpop.f32.mrf.mxu0 }
 0x32f   : > { %v1582_v1 = vld [vmem:[%s2438_s2] ss:$0 sm:$0xff] }
 0x330   : > { %v1004_v2 = vpop.f32.mrf.mxu0 }
 0x331   : > { %v1010_v3 = vsel %vm728_vm4, %v1004_v2, -inf }
 0x332   : > { %v1711_v5 = vpop.f32.mrf.mxu0  ;;  %1011 = vmax.xlane.f32.xlu0 %v1010_v3  ;;  %v658_v3 = vmul.f32 %v1582_v1, %v2242_v19  ;;  %v1861_v19 = vld [vmem:[%s2443_s7 + $0x8] sm:$0xff]  }
 0x333   : > { %1732 = vmatpush3.bf16.msra.mxu0 %v1861_v19 }
 0x334   : > { %v1007_v6 = vpop.f32.mrf.mxu0  ;;  %v659_v5 = vpack.c.bf16 %v658_v3, %v658_v3  ;;  %1733 = vmatprep.subr.bf16.mxu0 %v2031_v4 }
 0x336   : > { %v1712_v7 = vpop.f32.mrf.mxu0 }
 0x338   : > { %v1126_v8 = vpop.f32.mrf.mxu0 }
 0x339   : > { %v1132_v9 = vsel %vm728_vm4, %v1126_v8, -inf }
 0x33a   : > { %v1723_v10 = vpop.f32.mrf.mxu0  ;;  %1133 = vmax.xlane.f32.xlu0 %v1132_v9 }
 0x33c   : > { %v1129_v11 = vpop.f32.mrf.mxu0 }
 0x33e   : > { %v1724_v12 = vpop.f32.mrf.mxu0 }
 0x350   : > { %624 = vrot.lane.b32.xlu0 %v1626_v13, %s2036_s27 }
 0x3af   : > { %v778_v14 = vpop.xlane.xlu0 %777 }
 0x3b0   : > { %v779_v15 = vsub.f32 %v770_v55, %v778_v14 }
 0x3b2   : > { %v780_v16 = vmul.f32 1.442695, %v779_v15 }
 0x3b3   : > { %v890_v27 = vpop.xlane.xlu1 %889 }
 0x3b4   : > { %1875 = vpow2.f32 %v780_v16  ;;  %v891_v28 = vsub.f32 %v882_v59, %v890_v27 }
 0x3b6   : > { %v892_v29 = vmul.f32 1.442695, %v891_v28 }
 0x3b8   : > { %1877 = vpow2.f32 %v892_v29 }
 0x3bb   : > { %v1012_v17 = vpop.xlane.xlu0 %1011 }
 0x3bc   : > { %v1013_v30 = vsub.f32 %v1004_v2, %v1012_v17  ;;  %v1860_v2 = vld [vmem:[%s2445_s9] sm:$0xff]  }
 0x3bd   : > { %v1862_v17 = vld [vmem:[%s2443_s7] sm:$0xff]  }
 0x3be   : > { %v1014_v31 = vmul.f32 1.442695, %v1013_v30  ;;  %1734 = vmatpush3.bf16.msra.mxu0 %v1862_v17 }
 0x3bf   : > { %1747 = vmatprep.subr.bf16.mxu0 %v2031_v4 }
 0x3c0   : > { %1879 = vpow2.f32 %v1014_v31 }
 0x3c1   : > { %v1876_v18 = vpop.eup %1875 }
 0x3c2   : > { %v782_v20 = vsel %vm728_vm4, %v1876_v18, 0.0 }
 0x3c3   : > { %783 = vadd.xlane.f32.xlu0 %v782_v20  ;;  %v1134_v21 = vpop.xlane.xlu0 %1133 }
 0x3c4   : > { %v1135_v32 = vsub.f32 %v1126_v8, %v1134_v21 }
 0x3c5   : > { %v1878_v34 = vpop.eup %1877 }
 0x3c6   : > { %v1136_v33 = vmul.f32 1.442695, %v1135_v32  ;;  %v894_v35 = vsel %vm728_vm4, %v1878_v34, 0.0 }
 0x3c7   : > { %v625_v22 = vpop.permute.xlu0 %624 }
 0x3c8   : > { %628 = vst.msk [vmem:[#allocation3] sm:$0xf] %vm627_vm5, %v625_v22  ;;  %1881 = vpow2.f32 %v1136_v33 }
 0x3cd   : > { %v1880_v36 = vpop.eup %1879 }
 0x3ce   : > { %v1016_v37 = vsel %vm728_vm4, %v1880_v36, 0.0 }
 0x3cf   : > { %v788_v23 = vld [vmem:[#allocation3] sm:$0xf] }
 0x3d0   : > { %v1856_v24 = vld [vmem:[#allocation3] ss:$0 sps:$4 sm:$0xff]   ;;  %v793_v25 = vsel %vm732_vm3, %v788_v23, 0 }
 0x3d1   : > { %1690 = vmatpush3.bf16.msra.mxu1 %v793_v25  ;;  %904 = vrot.lane.b32.xlu1 %v1856_v24, %s2034_s17  ;;  %v1857_v26 = vld [vmem:[#allocation3] ss:$0 sps:$4 sm:$0xff]   ;;  %s2037_s17 = smov 8  }
 0x3d2   : > { %1701 = vmatprep.subr.bf16.mxu1 %v2031_v4  ;;  %v1858_v40 = vld [vmem:[#allocation3] ss:$0 sps:$4 sm:$0xff]  }
 0x3d5   : > { %v1882_v38 = vpop.eup %1881 }
 0x3d6   : > { %v1138_v39 = vsel %vm728_vm4, %v1882_v38, 0.0 }
 0x3d9   : > { %1148 = vrot.lane.b32.xlu0 %v1857_v26, %s2035_s19  ;;  %s469_s19 = sand.u32 1, %s2011_s26  }
 0x3da   : > { %s1569_s14 = sshll.u32 %s469_s19, 3 }
 0x3f5   : > { %895 = vadd.xlane.f32.xlu1 %v894_v35  ;;  %v1863_v35 = vld [vmem:[%s2447_s11 + $0x38] sm:$0xff]  }
 0x3f9   : > { %1017 = vadd.xlane.f32.xlu1 %v1016_v37  ;;  %v1864_v37 = vld [vmem:[%s2447_s11 + $0x30] sm:$0xff]  }
 0x3fd   : > { %1139 = vadd.xlane.f32.xlu1 %v1138_v39  ;;  %v1866_v39 = vld [vmem:[%s2447_s11 + $0x20] sm:$0xff]  }
 0x40e   : > { %1026 = vrot.lane.b32.xlu1 %v1858_v40, %s2033_s15  ;;  %v1867_v40 = vld [vmem:[%s2447_s11 + $0x18] sm:$0xff]  }
 0x443   : > { %v905_v44 = vpop.permute.xlu1 %904 }
 0x444   : > { %v910_v46 = vsel %vm732_vm3, %v905_v44, 0  ;;  %v1870_v44 = vld [vmem:[%s2447_s11] sm:$0xff]  }
 0x44c   : > { %v784_v41 = vpop.xlane.xlu0 %783 }
 0x44d   : > { %1883 = vrcp.f32 %v784_v41  ;;  %v1868_v41 = vld [vmem:[%s2447_s11 + $0x10] sm:$0xff]  }
 0x450   : > { %v1149_v57 = vpop.permute.xlu0 %1148 }
 0x451   : > { %v1154_v60 = vsel %vm732_vm3, %v1149_v57, 0 }
 0x45a   : > { %v1884_v42 = vpop.eup %1883 }
 0x45b   : > { %v786_v43 = vmul.f32 %v1884_v42, %v1876_v18  ;;  %v1869_v42 = vld [vmem:[%s2447_s11 + $0x8] sm:$0xff]  }
 0x45d   : > { %v787_v45 = vpack.c.bf16 %v786_v43, %v786_v43  ;;  %v1605_v43 = vld [vmem:[#allocation8] ss:$0 sm:$0xff] }
 0x45f   : > { %1692 = vmatmul.mubr.msk.bf16.vlgmr.msra.gmra.mxu1 %vm728_vm4, %v787_v45 }
 0x460   : > { %1702 = vmatpush3.bf16.msra.mxu1 %v910_v46  ;;  %1703 = vmatprep.mubr.msk.bf16.mxu1 %vm2032_vm1, %v2031_v4 }
 0x461   : > { %1713 = vmatprep.subr.bf16.mxu1 %v2031_v4 }
 0x47e   : > { %v896_v47 = vpop.xlane.xlu1 %895 }
 0x47f   : > { %1885 = vrcp.f32 %v896_v47 }
 0x482   : > { %v1018_v48 = vpop.xlane.xlu1 %1017 }
 0x483   : > { %1887 = vrcp.f32 %v1018_v48 }
 0x486   : > { %v1140_v49 = vpop.xlane.xlu1 %1139 }
 0x487   : > { %1889 = vrcp.f32 %v1140_v49 }
 0x48a   : > { %v1027_v52 = vpop.permute.xlu1 %1026 }
 0x48b   : > { %v1032_v55 = vsel %vm732_vm3, %v1027_v52, 0 }
 0x48c   : > { %v1886_v50 = vpop.eup %1885 }
 0x48d   : > { %v898_v51 = vmul.f32 %v1886_v50, %v1878_v34 }
 0x48f   : > { %v899_v53 = vpack.c.bf16 %v898_v51, %v898_v51  ;;  %v1601_v51 = vld [vmem:[#allocation5] ss:$0 sm:$0xff] }
 0x490   : > { %v1888_v54 = vpop.eup %1887 }
 0x491   : > { %1704 = vmatmul.mubr.msk.bf16.vlgmr.msra.gmra.mxu1 %vm728_vm4, %v899_v53  ;;  %v1020_v56 = vmul.f32 %v1888_v54, %v1880_v36  ;;  %v1609_v53 = vld [vmem:[%s2448_s12] ss:$0 sm:$0xff] }
 0x492   : > { %1714 = vmatpush3.bf16.msra.mxu1 %v1032_v55  ;;  %1715 = vmatprep.mubr.msk.bf16.mxu1 %vm2032_vm1, %v2031_v4 }
 0x493   : > { %1725 = vmatprep.subr.bf16.mxu1 %v2031_v4  ;;  %v1021_v58 = vpack.c.bf16 %v1020_v56, %v1020_v56 }
 0x494   : > { %v1890_v59 = vpop.eup %1889 }
 0x495   : > { %v1142_v61 = vmul.f32 %v1890_v59, %v1882_v38  ;;  %v1865_v38 = vld [vmem:[%s2447_s11 + $0x28] sm:$0xff]  }
 0x497   : > { %v1143_v63 = vpack.c.bf16 %v1142_v61, %v1142_v61 }
 0x499   : > { %1716 = vmatmul.mubr.msk.bf16.vlgmr.msra.gmra.mxu1 %vm728_vm4, %v1021_v58 }
 0x49a   : > { %1726 = vmatpush3.bf16.msra.mxu1 %v1154_v60  ;;  %1727 = vmatprep.mubr.msk.bf16.mxu1 %vm2032_vm1, %v2031_v4 }
 0x49b   : > { %1739 = vmatprep.subr.bf16.mxu1 %v2031_v4 }
 0x4a1   : > { %1728 = vmatmul.mubr.msk.bf16.vlgmr.msra.gmra.mxu1 %vm728_vm4, %v1143_v63 }
 0x4a2   : > { %1740 = vmatpush3.bf16.msra.mxu1 %v1859_v62  ;;  %1743 = vmatprep.mubr.msk.bf16.mxu1 %vm2032_vm1, %v2031_v4 }
 0x4a3   : > { %1741 = vmatprep.subr.bf16.mxu1 %v2031_v4 }
 0x4a6   : > { %1742 = vmatpush3.bf16.msra.mxu1 %v1860_v2 }
 0x4a9   : > { %1744 = vmatmul.mubr.msk.bf16.vlgmr.msra.gmra.mxu1 %vm483_vm0, %v659_v5 }
 0x51f   : > { %v829_v6 = vpop.f32.mrf.mxu1 }
 0x520   : > { %v835_v7 = vpack.c.bf16 %v829_v6, %v829_v6 }
 0x521   : > { %v1693_v8 = vpop.f32.mrf.mxu1 }
 0x522   : > { %837 = vst.msk [vmem:[#allocation4] sm:$0xf] %vm615_vm2, %v835_v7 }
 0x523   : > { %v832_v9 = vpop.f32.mrf.mxu1 }
 0x525   : > { %v1694_v10 = vpop.f32.mrf.mxu1 }
 0x551   : > { %v946_v11 = vpop.f32.mrf.mxu1 }
 0x552   : > { %v1627_v12 = vpack.c.bf16 %v946_v11, %v946_v11 }
 0x553   : > { %v1705_v13 = vpop.f32.mrf.mxu1 }
 0x554   : > { %956 = vrot.lane.b32.xlu1 %v1627_v12, %s2037_s17 }
 0x555   : > { %v949_v14 = vpop.f32.mrf.mxu1 }
 0x557   : > { %v1706_v15 = vpop.f32.mrf.mxu1 }
 0x559   : > { %v1068_v16 = vpop.f32.mrf.mxu1 }
 0x55a   : > { %v1628_v18 = vpack.c.bf16 %v1068_v16, %v1068_v16 }
 0x55b   : > { %v1717_v20 = vpop.f32.mrf.mxu1 }
 0x55c   : > { %1078 = vrot.lane.b32.xlu1 %v1628_v18, %s2038_s29  ;;  %s1619_s29 = sshll.u32 %s2019_s28, 7  ;;  %s1454_s28 = scalar_lea.sflag [#allocation7], %s469_s19 }
 0x55d   : > { %v1071_v21 = vpop.f32.mrf.mxu1  ;;  %s2389_s15 = scalar_lea.hbm %s2449_s13, %s1619_s29 }
 0x55f   : > { %v1718_v22 = vpop.f32.mrf.mxu1 }
 0x561   : > { %v1190_v23 = vpop.f32.mrf.mxu1 }
 0x562   : > { %v1629_v24 = vpack.c.bf16 %v1190_v23, %v1190_v23 }
 0x563   : > { %v1729_v25 = vpop.f32.mrf.mxu1 }
 0x564   : > { %1200 = vrot.lane.b32.xlu1 %v1629_v24, %s2039_s16  ;;  %s471_s16 = scalar_lea.vmem [#allocation10], %s1569_s14  ;;  %s2040_s14 = smov [#allocation10]  }
 0x565   : > { %v1193_v26 = vpop.f32.mrf.mxu1  ;;  %s1468_s21 = sshll.u32 %s471_s16, 4  ;;  %s1947_s24 = sshll.u32 %s2040_s14, 4  ;;  %s2391_s21 = int_to_ptr.vmem [resolvable:$true] %s1468_s21  ;;  %s1948_s24 = int_to_ptr.vmem [resolvable:$false] %s1947_s24 }
 0x566   : > { %s1943_s17 = scalar_lea.vmem %s2391_s21, 128  ;;  %s1949_s27 = scalar_lea.vmem %s1948_s24, 256 }
 0x567   : > { %v1730_v27 = vpop.f32.mrf.mxu1  ;;  %p1944_p8 = scmp.ne.s32.totalorder %s2391_s21, %s1943_s17  ;;  %p1950_p0 = scmp.lt.s32.totalorder %s2391_s21, %s1948_s24 }
 0x568   : > { %p1951_p6 = scmp.lt.s32.totalorder %s1949_s27, %s1943_s17 }
 0x569   : > { %v1333_v28 = vpop.f32.mrf.mxu1  ;;  %p1945_p11 = pnand %p1944_p8, %p2466_p10 }
 0x56a   : > { %v1334_v45 = vadd.f32 %v1605_v43, %v1333_v28  ;;  %p1952_p7 = por %p1951_p6, %p1950_p0 }
 0x56b   : > { %v1745_v29 = vpop.f32.mrf.mxu1  ;;  %p1946_p13 = pneg %p1945_p11 }
 0x56c   : > { %v1339_v46 = vpack.c.bf16 %v1334_v45, %v1334_v45 }
 0x56d   : > { %v1336_v30 = vpop.f32.mrf.mxu1  ;;  %p1953_p9 = pnand %p1952_p7, %p1946_p13 }
 0x56f   : > { %v1746_v31 = vpop.f32.mrf.mxu1 }
 0x5c6   : > { %v957_v32 = vpop.permute.xlu1 %956 }
 0x5c7   : > { %960 = vst.msk [vmem:[#allocation4] sm:$0xf] %vm959_vm6, %v957_v32 }
 0x5ce   : > { %v1079_v33 = vpop.permute.xlu1 %1078 }
 0x5cf   : > { %1082 = vst.msk [vmem:[#allocation4] sm:$0xf] %vm1081_vm7, %v1079_v33 }
 0x5d6   : > { %v1201_v34 = vpop.permute.xlu1 %1200 }
 0x5d7   : > { %1204 = vst.msk [vmem:[#allocation4] sm:$0xf] %vm1203_vm8, %v1201_v34 }
 0x5de   : > { %v1205_v36 = vld [vmem:[#allocation4] sm:$0xf] }
 0x5df   : > { %1736 = vmatmul.mubr.msk.bf16.vlgmr.msra.gmra.mxu0 %vm483_vm0, %v1205_v36 }
 0x5e0   : > { %1748 = vmatpush3.bf16.msra.mxu0 %v1863_v35  ;;  %1763 = vmatprep.mubr.msk.bf16.mxu0 %vm2032_vm1, %v2031_v4 }
 0x5e1   : > { %1749 = vmatprep.subr.bf16.mxu0 %v2031_v4 }
 0x5e4   : > { %1750 = vmatpush3.bf16.msra.mxu0 %v1864_v37 }
 0x5e5   : > { %1751 = vmatprep.subr.bf16.mxu0 %v2031_v4 }
 0x5e8   : > { %1752 = vmatpush3.bf16.msra.mxu0 %v1865_v38 }
 0x5e9   : > { %1753 = vmatprep.subr.bf16.mxu0 %v2031_v4 }
 0x5ec   : > { %1754 = vmatpush3.bf16.msra.mxu0 %v1866_v39 }
 0x5ed   : > { %1755 = vmatprep.subr.bf16.mxu0 %v2031_v4 }
 0x5f0   : > { %1756 = vmatpush3.bf16.msra.mxu0 %v1867_v40 }
 0x5f1   : > { %1757 = vmatprep.subr.bf16.mxu0 %v2031_v4 }
 0x5f4   : > { %1758 = vmatpush3.bf16.msra.mxu0 %v1868_v41 }
 0x5f5   : > { %1759 = vmatprep.subr.bf16.mxu0 %v2031_v4 }
 0x5f8   : > { %1760 = vmatpush3.bf16.msra.mxu0 %v1869_v42 }
 0x5f9   : > { %1761 = vmatprep.subr.bf16.mxu0 %v2031_v4 }
 0x5fc   : > { %1762 = vmatpush3.bf16.msra.mxu0 %v1870_v44 }
 0x5ff   : > { %1764 = vmatmul.mubr.bf16.vlgmr.msra.gmra.mxu0 %v1339_v46 }
 0x69f   : > { %v1266_v47 = vpop.f32.mrf.mxu0 }
 0x6a0   : > { %v1267_v52 = vadd.f32 %v1601_v51, %v1266_v47 }
 0x6a1   : > { %v1737_v48 = vpop.f32.mrf.mxu0 }
 0x6a2   : > { %v1272_v4 = vadd.f32 %v1267_v52, %v2215_v0 }
 0x6a3   : > { %v1269_v49 = vpop.f32.mrf.mxu0 }
 0x6a5   : > { %v1738_v50 = vpop.f32.mrf.mxu0 }
 0x6bf   : > { %v1445_v54 = vpop.f32.mrf.mxu0 }
 0x6c0   : > { %v1446_v55 = vadd.f32 %v1609_v53, %v1445_v54 }
 0x6c1   : > { %v1765_v56 = vpop.f32.mrf.mxu0 }
 0x6c2   : > { %v1451_v57 = vadd.f32 %v1446_v55, %v1272_v4 }
 0x6c3   : > { %v1448_v58 = vpop.f32.mrf.mxu0 }
 0x6c4   : > { %1452 = vst.msk [vmem:[%s471_s16] sm:$0xff] %vm483_vm0, %v1451_v57 }
 0x6c5   : > { %v1766_v59 = vpop.f32.mrf.mxu0 }
 0x6c6   : > { %1956 = shalt.err (!%p1953_p9)
}
 0x6c7   : > { %s1957_s29 = scalar_lea.hbm %s2389_s15, 128  ;;  %s1961_s22 = scalar_lea.hbm %s2449_s13, 256 }
 0x6c8   : > { %p1958_p12 = scmp.ne.s32.totalorder %s2389_s15, %s1957_s29  ;;  %p1962_p5 = scmp.lt.s32.totalorder %s2389_s15, %s2449_s13 }
 0x6c9   : > { %p1963_p3 = scmp.lt.s32.totalorder %s1961_s22, %s1957_s29 }
 0x6ca   : > { %p1959_p1 = pnand %p1958_p12, %p2466_p10 }
 0x6cb   : > { %p1964_p4 = por %p1963_p3, %p1962_p5 }
 0x6cc   : > { %p1960_p2 = pneg %p1959_p1 }
 0x6ce   : > { %p1965_p8 = pnand %p1964_p4, %p1960_p2 }
 0x6d0   : > { %1968 = shalt.err (!%p1965_p8)
}
 0x6d1   : > { %1775 = dma.vmem_to_hbm [thread:$0]  (%p2466_p10), %s2391_s21, 128, %s2389_s15, %s1454_s28  }
 0x6d2 PF: > { %p1792_p11 = scmp.ge.s32.totalorder %s2027_s30, 2  ;;  %s1480_s17 = sand.u32 1, %s2007_s25  }
 0x6d3   : > { %p2467_p13 = scmp.ne.s32.totalorder %s2460_s20, 0  ;;  %s1481_s24 = scalar_lea.sflag [#allocation7], %s1480_s17 }
 0x6d5   : > { %p1785_p0 = pnand %p1792_p11, %p2467_p13 }
 0x6d7   : > { %p1786_p6 = pneg %p1785_p0 }
 0x6d9   : > { %2002 = dma.done.wait (%p1786_p6), %s1481_s24, 128  }
 0x6da   : > { %2004 = vsyncadd (%p1786_p6), %s1481_s24, 4294967168  ;;  %s28_s30 = sadd.s32 1, %s2027_s30   ;;  %s2468_s18 = sld [smem:[#allocation14_spill]] }
 0x6db   : > { %p25_p7 = scmp.ge.s32.totalorder %s28_s30, 4   ;;  %s2469_s27 = sld [smem:[#allocation17_spill]] }
 0x6dc   : > { %s2470_s28 = sld [smem:[#allocation15_spill]]  ;;  %s2472_s25 = smov %s2011_s26 }
 0x6dd   : > { %s2471_s29 = sld [smem:[#allocation16_spill]]  ;;  %27 = sbr.rel (!%p25_p7) target bundleno = 6 (0x6), region = 121 }
 0x6e0   : > { %s2473_s26 = smov %s2468_s18 }
 0x6e2   :  { %1486 = vsyncpa [#allocation6], 1 }
 0x6e3   :  { %1488 = vsyncpa [#allocation6 + $0x1], 1 }
 0x6e4   :  { %1489 = vsyncpa [#allocation9], 1 }
 0x6e5   :  { %1490 = vsyncpa [#allocation7], 1 }
 0x6e6   :  { %1492 = vsyncpa [#allocation7 + $0x1], 1 }

// kernel: tpu_custom_call.1
= control target key start
LH: loop header
LB: loop body
LE: loop exit
PB: predicated region body
PF: predicated region fallthrough
CT: control target
= control target key end

     0   :  { %18 = vsyncpa [#allocation6], 0  ;;  %s2436_s0 = inlined_call_operand.vmem [shape: f32[2,8,32], index: 0, kind: input, shape index: {}]   ;;  %s2437_s1 = inlined_call_operand.vmem [shape: f32[1,32], index: 1, kind: input, shape index: {}]   ;;  %s2438_s2 = inlined_call_operand.vmem [shape: f32[1,32], index: 2, kind: input, shape index: {}]   ;;  %s2439_s3 = inlined_call_operand.vmem [shape: bf16[32,32], index: 3, kind: input, shape index: {}]   ;;  %s2440_s4 = inlined_call_operand.vmem [shape: f32[1,32], index: 4, kind: input, shape index: {}]   ;;  %s2441_s5 = inlined_call_operand.vmem [shape: bf16[32,64], index: 5, kind: input, shape index: {}]   ;;  %s2442_s6 = inlined_call_operand.vmem [shape: f32[1,64], index: 6, kind: input, shape index: {}]   ;;  %s2443_s7 = inlined_call_operand.vmem [shape: bf16[32,32], index: 7, kind: input, shape index: {}]   ;;  %s2444_s8 = inlined_call_operand.hbm [shape: f32[1,32], index: 8, kind: input, shape index: {}]   ;;  %s2445_s9 = inlined_call_operand.vmem [shape: bf16[32,128], index: 9, kind: input, shape index: {}]   ;;  %s2446_s10 = inlined_call_operand.hbm [shape: f32[1,128], index: 10, kind: input, shape index: {}]   ;;  %s2447_s11 = inlined_call_operand.vmem [shape: bf16[128,32], index: 11, kind: input, shape index: {}]   ;;  %s2448_s12 = inlined_call_operand.vmem [shape: f32[1,32], index: 12, kind: input, shape index: {}]   ;;  %s2449_s13 = inlined_call_operand.hbm [shape: f32[2,8,32], index: 13, kind: output, shape index: {}]  }
   0x1   :  { %19 = vsyncpa [#allocation9], 0 }
   0x2   :  { %20 = vsyncpa [#allocation7], 0 }
   0x3   :  { %22 = vsyncpa [#allocation7 + $0x1], 0  ;;  %s2111_s25 = smov 0   ;;  %s2113_s26 = smov 0  }
   0x4   :  { %s2115_s27 = smov 0   ;;  %s2117_s28 = smov 0  }
   0x5   :  { %s2119_s29 = smov 0   ;;  %s2121_s30 = smov 0  }
   0x6 LB: > { %2456 = sst [smem:[#allocation14_spill]] %s2015_s27  ;;  %s1560_s14 = sadd.s32 4294967295, %s2027_s30   ;;  %s2027_s30 = sphi %s2121_s30, %s28_s30   ;;  %s2023_s29 = sphi %s2119_s29, %s2471_s29   ;;  %s2019_s28 = sphi %s2117_s28, %s2470_s28   ;;  %s2015_s27 = sphi %s2115_s27, %s2469_s27   ;;  %s2011_s26 = sphi %s2113_s26, %s2473_s26   ;;  %s2007_s25 = sphi %s2111_s25, %s2472_s25  }
   0x7   : > { %2457 = sst [smem:[#allocation15_spill]] %s2023_s29  ;;  %s1561_s15 = sadd.s32 4294967294, %s2027_s30  }
   0x8   : > { %s40_s16 = sadd.s32 1, %s2023_s29  ;;  %s327_s17 = sadd.s32 1, %s2015_s27 }
   0x9   : > { %p42_p0 = scmp.ge.s32.totalorder %s40_s16, 2  ;;  %p337_p1 = scmp.ne.s32.totalorder %s2015_s27, %s2011_s26 }
   0xa   : > { %p338_p2 = scmp.eq.s32.totalorder %s1560_s14, 1  ;;  %p343_p3 = scmp.ne.s32.totalorder %s2011_s26, %s2007_s25 }
   0xb   : > { %s2475_s16 = smov (%p42_p0, %s40_s16), 0  ;;  %p344_p5 = scmp.eq.s32.totalorder %s1561_s15, 1 }
   0xc   : > { %2458 = sst [smem:[#allocation16_spill]] %s2475_s16  ;;  %p2151_p4 = por %p338_p2, %p337_p1 }
   0xd   : > { %s322_s19 = ssub.s32 %s2023_s29, %s2475_s16  ;;  %p1562_p6 = scmp.ge.s32.totalorder %s2027_s30, 1 }
   0xe   : > { %s2459_s18 = scalar_select %p2151_p4, 1, 0 }
   0xf   : > { %p325_p7 = scmp.eq.s32.totalorder %s322_s19, 0  ;;  %p2158_p8 = por %p344_p5, %p343_p3 }
  0x10   : > { %p351_p9 = scmp.lt.s32.totalorder %s2027_s30, 3  ;;  %p2170_p11 = scmp.eq.s32.totalorder %s1560_s14, 0 }
  0x11   : > { %s2460_s20 = scalar_select %p2158_p8, 1, 0 }
  0x12   : > { %s2164_s21 = scalar_select %p325_p7, %s2015_s27, %s327_s17  }
  0x13   : > { %p2166_p10 = pnand %p1562_p6, %p351_p9  ;;  %s2029_s24 = smov [#allocation5]  }
  0x14   : > { %2461 = sst [smem:[#allocation17_spill]] %s2164_s21  ;;  %s385_s15 = sshll.u32 %s2029_s24, 4  ;;  %s386_s15 = int_to_ptr.vmem [resolvable:$true] %s385_s15 }
  0x15   : > { %s2463_s23 = scalar_select %p2170_p11, 1, 0 }
  0x16   : > { %p1777_p12 = pneg %p2166_p10  ;;  %s2030_s19 = smov [#allocation8]  }
  0x17   : > { %s399_s16 = sshll.u32 %s2030_s19, 4  ;;  %s1902_s14 = scalar_lea.vmem %s386_s15, 16  ;;  %s400_s16 = int_to_ptr.vmem [resolvable:$true] %s399_s16 }
  0x18   : > { %p2178_p13 = pnand %p2170_p11, %p1777_p12  ;;  %p1903_p1 = scmp.ne.s32.totalorder %s386_s15, %s1902_s14 }
  0x19   : > { %s1909_s24 = scalar_lea.vmem %s386_s15, 32  ;;  %p1910_p5 = scmp.lt.s32.totalorder %s386_s15, %s386_s15 }
  0x1a   : > { %p1893_p0 = pneg %p2178_p13  ;;  %p1911_p6 = scmp.lt.s32.totalorder %s1909_s24, %s1902_s14 }
  0x1c   : > { %p1905_p2 = pnand %p1903_p1, %p1893_p0  ;;  %p1912_p7 = por %p1911_p6, %p1910_p5 }
  0x1e   : > { %p1906_p3 = pneg %p1905_p2 }
  0x20   : > { %p1913_p9 = pnand %p1912_p7, %p1906_p3 }
  0x22   : > { %1916 = shalt.err (!%p1913_p9)
}
  0x23   : > { %1780 = dma.hbm_to_vmem [thread:$0]  (!%p2178_p13), %s2444_s8, 16, %s386_s15, [#allocation6]  }
  0x24   : > { %s1928_s21 = scalar_lea.vmem %s400_s16, 16  ;;  %s1935_s27 = scalar_lea.vmem %s400_s16, 32 }
  0x25   : > { %p1929_p12 = scmp.ne.s32.totalorder %s400_s16, %s1928_s21  ;;  %p1936_p2 = scmp.lt.s32.totalorder %s400_s16, %s400_s16 }
  0x26   : > { %p1937_p4 = scmp.lt.s32.totalorder %s1935_s27, %s1928_s21 }
  0x27   : > { %p1931_p8 = pnand %p1929_p12, %p1893_p0 }
  0x28   : > { %p1938_p11 = por %p1937_p4, %p1936_p2 }
  0x29   : > { %p1932_p1 = pneg %p1931_p8 }
  0x2b   : > { %p1939_p5 = pnand %p1938_p11, %p1932_p1 }
  0x2d   : > { %1942 = shalt.err (!%p1939_p5)
}
  0x2e   : > { %1783 = dma.hbm_to_vmem [thread:$0]  (!%p2178_p13), %s2446_s10, 16, %s400_s16, [#allocation9]  }
  0x2f   : > { %425 = sbr.rel (%p2166_p10) target bundleno = 1746 (0x6d2), region = 72  ;;  %p2465_p3 = scmp.ne.s32.totalorder (!%p2166_p10), %s2463_s23, 0 }
  0x34   : > { %1994 = dma.done.wait (%p2465_p3), [#allocation6], 16  }
  0x35   : > { %1996 = vsyncadd (%p2465_p3), [#allocation6], 4294967280 }
  0x36   : > { %1998 = dma.done.wait (%p2465_p3), [#allocation9], 16  }
  0x37   : > { %2000 = vsyncadd (%p2465_p3), [#allocation9], 4294967280  ;;  %p472_p4 = scmp.lt.s32.totalorder %s2019_s28, 1  ;;  %vm483_vm0 = vcmask 261120   ;;  %v1852_v3 = vld [vmem:[%s2441_s5 + $0x8] sm:$0xff]   ;;  %v2031_v4 = vmov 0.0  }
  0x38   : > { %1667 = vmatprep.subr.bf16.mxu1 %v2031_v4  ;;  %vm2032_vm1 = vmmov 0   ;;  %v1853_v5 = vld [vmem:[%s2441_s5] sm:$0xff]   ;;  %1695 = vmatprep.subr.bf16.mxu0 %v2031_v4  ;;  %v1854_v17 = vld [vmem:[%s2439_s3 + $0x8] sm:$0xff]   ;;  %s2033_s15 = smov 112   ;;  %s2034_s17 = smov 120   ;;  %vm615_vm2 = vcmask 60416  }
  0x39   : > { %s473_s27 = scalar_select %p472_p4, %s2019_s28, 1  ;;  %1671 = vmatprep.mubr.msk.bf16.mxu1 %vm2032_vm1, %v2031_v4  ;;  %1668 = vmatpush3.bf16.msra.mxu1 %v1852_v3  ;;  %v1571_v13 = vld [vmem:[%s2437_s1] ss:$0 sm:$0xff]  ;;  %vm732_vm3 = vcmask 1043456   ;;  %vm728_vm4 = vcmask 64512   ;;  %vm627_vm5 = vcmask 257024  }
  0x3a   : > { %1669 = vmatprep.subr.bf16.mxu1 %v2031_v4  ;;  %1697 = vmatprep.mubr.msk.bf16.mxu0 %vm2032_vm1, %v2031_v4  ;;  %v1855_v21 = vld [vmem:[%s2439_s3] sm:$0xff]   ;;  %s2035_s19 = smov 104   ;;  %s2039_s16 = smov 24   ;;  %vm959_vm6 = vcmask 126016   ;;  %vm1081_vm7 = vcmask 191616   ;;  %vm1203_vm8 = vcmask 257216  }
  0x3b   : > { %s1570_s29 = sshll.u32 %s473_s27, 3  ;;  %v1583_v27 = vld [vmem:[%s2440_s4] ss:$0 sm:$0xff]  ;;  %s2036_s27 = smov 96  }
  0x3c   : > { %s475_s22 = scalar_lea.vmem %s2436_s0, %s1570_s29  ;;  %v1572_v34 = vld [vmem:[%s2442_s6] ss:$0 sm:$0xff]  ;;  %s2038_s29 = smov 16  }
  0x3d   : > { %v2215_v0 = vld [vmem:[%s475_s22] sm:$0xff]  ;;  %1670 = vmatpush3.bf16.msra.mxu1 %v1853_v5  ;;  %p2466_p10 = scmp.ne.s32.totalorder %s2459_s18, 0 }
  0x3e   : > { %v482_v1 = vmul.f32 %v2215_v0, %v2215_v0  ;;  %1675 = vmatprep.subr.bf16.mxu1 %v2031_v4 }
  0x40   : > { %v484_v2 = vsel %vm483_vm0, %v482_v1, 0.0 }
  0x41   : > { %485 = vadd.xlane.f32.xlu0 %v484_v2 }
  0x45   : > { %635 = vadd.xlane.f32.xlu0 %v484_v2 }
  0xca   : > { %v486_v6 = vpop.xlane.xlu0 %485 }
  0xcb   : > { %v488_v7 = vmul.f32 0.03125, %v486_v6 }
  0xcd   : > { %v489_v8 = vadd.f32 1e-06, %v488_v7 }
  0xce   : > { %v636_v9 = vpop.xlane.xlu0 %635 }
  0xcf   : > { %1871 = vrsqrt.f32 %v489_v8  ;;  %v638_v10 = vmul.f32 0.03125, %v636_v9 }
  0xd1   : > { %v639_v11 = vadd.f32 1e-06, %v638_v10 }
  0xd3   : > { %1873 = vrsqrt.f32 %v639_v11 }
  0xdc   : > { %v1872_v12 = vpop.eup %1871 }
  0xdd   : > { %v491_v14 = vmul.f32 %v1872_v12, %v2215_v0 }
  0xdf   : > { %v499_v15 = vmul.f32 %v1571_v13, %v491_v14 }
  0xe0   : > { %v1874_v16 = vpop.eup %1873 }
  0xe1   : > { %v500_v18 = vpack.c.bf16 %v499_v15, %v499_v15  ;;  %v2242_v19 = vmul.f32 %v1874_v16, %v2215_v0 }
  0xe3   : > { %1672 = vmatmul.mubr.msk.bf16.vlgmr.msra.gmra.mxu1 %vm483_vm0, %v500_v18  ;;  %v649_v20 = vmul.f32 %v1571_v13, %v2242_v19 }
  0xe4   : > { %1676 = vmatpush3.bf16.msra.mxu1 %v1854_v17  ;;  %1679 = vmatprep.mubr.msk.bf16.mxu1 %vm2032_vm1, %v2031_v4 }
  0xe5   : > { %1677 = vmatprep.subr.bf16.mxu1 %v2031_v4  ;;  %v650_v22 = vpack.c.bf16 %v649_v20, %v649_v20 }
  0xe8   : > { %1678 = vmatpush3.bf16.msra.mxu1 %v1855_v21 }
  0xe9   : > { %1683 = vmatprep.subr.bf16.mxu1 %v2031_v4 }
  0xeb   : > { %1680 = vmatmul.mubr.msk.bf16.vlgmr.msra.gmra.mxu1 %vm483_vm0, %v650_v22 }
  0xec   : > { %1685 = vmatprep.mubr.msk.bf16.mxu1 %vm2032_vm1, %v2031_v4 }
 0x1a3   : > { %v561_v23 = vpop.f32.mrf.mxu1 }
 0x1a4   : > { %v2265_v35 = vadd.f32 %v1572_v34, %v561_v23 }
 0x1a5   : > { %v1673_v24 = vpop.f32.mrf.mxu1 }
 0x1a6   : > { %v1626_v13 = vpack.c.bf16 %v2265_v35, %v2265_v35 }
 0x1a7   : > { %v564_v25 = vpop.f32.mrf.mxu1 }
 0x1a9   : > { %v1674_v26 = vpop.f32.mrf.mxu1 }
 0x1ab   : > { %v720_v28 = vpop.f32.mrf.mxu1 }
 0x1ac   : > { %v721_v29 = vadd.f32 %v1583_v27, %v720_v28 }
 0x1ad   : > { %v1681_v30 = vpop.f32.mrf.mxu1 }
 0x1ae   : > { %v726_v31 = vpack.c.bf16 %v721_v29, %v721_v29 }
 0x1af   : > { %v723_v32 = vpop.f32.mrf.mxu1 }
 0x1b0   : > { %962 = vrot.lane.b32.xlu0 %v726_v31, %s2033_s15  ;;  %840 = vrot.lane.b32.xlu1 %v726_v31, %s2034_s17 }
 0x1b1   : > { %v1682_v33 = vpop.f32.mrf.mxu1 }
 0x1b4   : > { %1084 = vrot.lane.b32.xlu0 %v726_v31, %s2035_s19 }
 0x1d9   : > { %567 = vxpose.xlu1.b32.start.end [1/1] (short) (narrow) %v2265_v35, 32 }
 0x222   : > { %v841_v36 = vpop.permute.xlu1 %840  ;;  %v963_v53 = vpop.permute.xlu0 %962 }
 0x226   : > { %v1085_v54 = vpop.permute.xlu0 %1084 }
 0x255   : > { %v583_v37 = vpop.trf.xlu1 }
 0x256   : > { %v1622_v38 = vpack.c.bf16 %v583_v37, %v583_v37 }
 0x258   : > { %616 = vst.msk [vmem:[#allocation2] sm:$0xf] %vm615_vm2, %v1622_v38 }
 0x259   : > { %v584_v39 = vpop.trf.xlu1 }
 0x25a   : > { %v1623_v40 = vpack.c.bf16 %v584_v39, %v584_v39 }
 0x25c   : > { %617 = vst.msk [vmem:[#allocation2 + $0x4] sm:$0xf] %vm615_vm2, %v1623_v40 }
 0x25d   : > { %v585_v41 = vpop.trf.xlu1 }
 0x25e   : > { %v1624_v42 = vpack.c.bf16 %v585_v41, %v585_v41 }
 0x25f   : > { %v727_v43 = vld [vmem:[#allocation2] sm:$0xf] }
 0x260   : > { %618 = vst.msk [vmem:[#allocation2 + $0x8] sm:$0xf] %vm615_vm2, %v1624_v42  ;;  %v734_v44 = vsel %vm732_vm3, %v727_v43, 0 }
 0x261   : > { %1684 = vmatpush3.bf16.msra.mxu1 %v734_v44  ;;  %v586_v45 = vpop.trf.xlu1 }
 0x262   : > { %v1625_v46 = vpack.c.bf16 %v586_v45, %v586_v45  ;;  %1689 = vmatprep.subr.bf16.mxu1 %v2031_v4 }
 0x263   : > { %v838_v47 = vld [vmem:[#allocation2 + $0x4] sm:$0xf] }
 0x264   : > { %1686 = vmatmul.mubr.msk.bf16.vlgmr.msra.gmra.mxu1 %vm728_vm4, %v726_v31  ;;  %v846_v48 = vsel %vm732_vm3, %v838_v47, 0  ;;  %619 = vst.msk [vmem:[#allocation2 + $0xc] sm:$0xf] %vm615_vm2, %v1625_v46 }
 0x265   : > { %1696 = vmatpush3.bf16.msra.mxu0 %v846_v48  ;;  %1691 = vmatprep.mubr.msk.bf16.mxu1 %vm2032_vm1, %v2031_v4 }
 0x266   : > { %1707 = vmatprep.subr.bf16.mxu0 %v2031_v4 }
 0x267   : > { %v961_v49 = vld [vmem:[#allocation2 + $0x8] sm:$0xf] }
 0x268   : > { %1698 = vmatmul.mubr.msk.bf16.vlgmr.msra.gmra.mxu0 %vm728_vm4, %v841_v36  ;;  %v968_v50 = vsel %vm732_vm3, %v961_v49, 0 }
 0x269   : > { %1708 = vmatpush3.bf16.msra.mxu0 %v968_v50  ;;  %1709 = vmatprep.mubr.msk.bf16.mxu0 %vm2032_vm1, %v2031_v4 }
 0x26a   : > { %1719 = vmatprep.subr.bf16.mxu0 %v2031_v4 }
 0x26b   : > { %v1083_v51 = vld [vmem:[#allocation2 + $0xc] sm:$0xf] }
 0x26c   : > { %v1090_v52 = vsel %vm732_vm3, %v1083_v51, 0 }
 0x270   : > { %1710 = vmatmul.mubr.msk.bf16.vlgmr.msra.gmra.mxu0 %vm728_vm4, %v963_v53 }
 0x271   : > { %1720 = vmatpush3.bf16.msra.mxu0 %v1090_v52  ;;  %1721 = vmatprep.mubr.msk.bf16.mxu0 %vm2032_vm1, %v2031_v4 }
 0x272   : > { %1731 = vmatprep.subr.bf16.mxu0 %v2031_v4 }
 0x278   : > { %1722 = vmatmul.mubr.msk.bf16.vlgmr.msra.gmra.mxu0 %vm728_vm4, %v1085_v54 }
 0x279   : > { %1735 = vmatprep.mubr.msk.bf16.mxu0 %vm2032_vm1, %v2031_v4 }
 0x324   : > { %v770_v55 = vpop.f32.mrf.mxu1 }
 0x325   : > { %v776_v56 = vsel %vm728_vm4, %v770_v55, -inf }
 0x326   : > { %777 = vmax.xlane.f32.xlu0 %v776_v56  ;;  %v1687_v57 = vpop.f32.mrf.mxu1 }
 0x328   : > { %v773_v58 = vpop.f32.mrf.mxu1  ;;  %v882_v59 = vpop.f32.mrf.mxu0 }
 0x329   : > { %v888_v60 = vsel %vm728_vm4, %v882_v59, -inf }
 0x32a   : > { %889 = vmax.xlane.f32.xlu1 %v888_v60  ;;  %v1688_v61 = vpop.f32.mrf.mxu1  ;;  %v1699_v62 = vpop.f32.mrf.mxu0 }
 0x32b   : > { %v1859_v62 = vld [vmem:[%s2445_s9 + $0x8] sm:$0xff]  }
 0x32c   : > { %v885_v63 = vpop.f32.mrf.mxu0 }
 0x32e   : > { %v1700_v1 = vpop.f32.mrf.mxu0 }
 0x32f   : > { %v1582_v1 = vld [vmem:[%s2438_s2] ss:$0 sm:$0xff] }
 0x330   : > { %v1004_v2 = vpop.f32.mrf.mxu0 }
 0x331   : > { %v1010_v3 = vsel %vm728_vm4, %v1004_v2, -inf }
 0x332   : > { %v1711_v5 = vpop.f32.mrf.mxu0  ;;  %1011 = vmax.xlane.f32.xlu0 %v1010_v3  ;;  %v658_v3 = vmul.f32 %v1582_v1, %v2242_v19  ;;  %v1861_v19 = vld [vmem:[%s2443_s7 + $0x8] sm:$0xff]  }
 0x333   : > { %1732 = vmatpush3.bf16.msra.mxu0 %v1861_v19 }
 0x334   : > { %v1007_v6 = vpop.f32.mrf.mxu0  ;;  %v659_v5 = vpack.c.bf16 %v658_v3, %v658_v3  ;;  %1733 = vmatprep.subr.bf16.mxu0 %v2031_v4 }
 0x336   : > { %v1712_v7 = vpop.f32.mrf.mxu0 }
 0x338   : > { %v1126_v8 = vpop.f32.mrf.mxu0 }
 0x339   : > { %v1132_v9 = vsel %vm728_vm4, %v1126_v8, -inf }
 0x33a   : > { %v1723_v10 = vpop.f32.mrf.mxu0  ;;  %1133 = vmax.xlane.f32.xlu0 %v1132_v9 }
 0x33c   : > { %v1129_v11 = vpop.f32.mrf.mxu0 }
 0x33e   : > { %v1724_v12 = vpop.f32.mrf.mxu0 }
 0x350   : > { %624 = vrot.lane.b32.xlu0 %v1626_v13, %s2036_s27 }
 0x3af   : > { %v778_v14 = vpop.xlane.xlu0 %777 }
 0x3b0   : > { %v779_v15 = vsub.f32 %v770_v55, %v778_v14 }
 0x3b2   : > { %v780_v16 = vmul.f32 1.442695, %v779_v15 }
 0x3b3   : > { %v890_v27 = vpop.xlane.xlu1 %889 }
 0x3b4   : > { %1875 = vpow2.f32 %v780_v16  ;;  %v891_v28 = vsub.f32 %v882_v59, %v890_v27 }
 0x3b6   : > { %v892_v29 = vmul.f32 1.442695, %v891_v28 }
 0x3b8   : > { %1877 = vpow2.f32 %v892_v29 }
 0x3bb   : > { %v1012_v17 = vpop.xlane.xlu0 %1011 }
 0x3bc   : > { %v1013_v30 = vsub.f32 %v1004_v2, %v1012_v17  ;;  %v1860_v2 = vld [vmem:[%s2445_s9] sm:$0xff]  }
 0x3bd   : > { %v1862_v17 = vld [vmem:[%s2443_s7] sm:$0xff]  }
 0x3be   : > { %v1014_v31 = vmul.f32 1.442695, %v1013_v30  ;;  %1734 = vmatpush3.bf16.msra.mxu0 %v1862_v17 }
 0x3bf   : > { %1747 = vmatprep.subr.bf16.mxu0 %v2031_v4 }
 0x3c0   : > { %1879 = vpow2.f32 %v1014_v31 }
 0x3c1   : > { %v1876_v18 = vpop.eup %1875 }
 0x3c2   : > { %v782_v20 = vsel %vm728_vm4, %v1876_v18, 0.0 }
 0x3c3   : > { %783 = vadd.xlane.f32.xlu0 %v782_v20  ;;  %v1134_v21 = vpop.xlane.xlu0 %1133 }
 0x3c4   : > { %v1135_v32 = vsub.f32 %v1126_v8, %v1134_v21 }
 0x3c5   : > { %v1878_v34 = vpop.eup %1877 }
 0x3c6   : > { %v1136_v33 = vmul.f32 1.442695, %v1135_v32  ;;  %v894_v35 = vsel %vm728_vm4, %v1878_v34, 0.0 }
 0x3c7   : > { %v625_v22 = vpop.permute.xlu0 %624 }
 0x3c8   : > { %628 = vst.msk [vmem:[#allocation3] sm:$0xf] %vm627_vm5, %v625_v22  ;;  %1881 = vpow2.f32 %v1136_v33 }
 0x3cd   : > { %v1880_v36 = vpop.eup %1879 }
 0x3ce   : > { %v1016_v37 = vsel %vm728_vm4, %v1880_v36, 0.0 }
 0x3cf   : > { %v788_v23 = vld [vmem:[#allocation3] sm:$0xf] }
 0x3d0   : > { %v1856_v24 = vld [vmem:[#allocation3] ss:$0 sps:$4 sm:$0xff]   ;;  %v793_v25 = vsel %vm732_vm3, %v788_v23, 0 }
 0x3d1   : > { %1690 = vmatpush3.bf16.msra.mxu1 %v793_v25  ;;  %904 = vrot.lane.b32.xlu1 %v1856_v24, %s2034_s17  ;;  %v1857_v26 = vld [vmem:[#allocation3] ss:$0 sps:$4 sm:$0xff]   ;;  %s2037_s17 = smov 8  }
 0x3d2   : > { %1701 = vmatprep.subr.bf16.mxu1 %v2031_v4  ;;  %v1858_v40 = vld [vmem:[#allocation3] ss:$0 sps:$4 sm:$0xff]  }
 0x3d5   : > { %v1882_v38 = vpop.eup %1881 }
 0x3d6   : > { %v1138_v39 = vsel %vm728_vm4, %v1882_v38, 0.0 }
 0x3d9   : > { %1148 = vrot.lane.b32.xlu0 %v1857_v26, %s2035_s19  ;;  %s469_s19 = sand.u32 1, %s2011_s26  }
 0x3da   : > { %s1569_s14 = sshll.u32 %s469_s19, 3 }
 0x3f5   : > { %895 = vadd.xlane.f32.xlu1 %v894_v35  ;;  %v1863_v35 = vld [vmem:[%s2447_s11 + $0x38] sm:$0xff]  }
 0x3f9   : > { %1017 = vadd.xlane.f32.xlu1 %v1016_v37  ;;  %v1864_v37 = vld [vmem:[%s2447_s11 + $0x30] sm:$0xff]  }
 0x3fd   : > { %1139 = vadd.xlane.f32.xlu1 %v1138_v39  ;;  %v1866_v39 = vld [vmem:[%s2447_s11 + $0x20] sm:$0xff]  }
 0x40e   : > { %1026 = vrot.lane.b32.xlu1 %v1858_v40, %s2033_s15  ;;  %v1867_v40 = vld [vmem:[%s2447_s11 + $0x18] sm:$0xff]  }
 0x443   : > { %v905_v44 = vpop.permute.xlu1 %904 }
 0x444   : > { %v910_v46 = vsel %vm732_vm3, %v905_v44, 0  ;;  %v1870_v44 = vld [vmem:[%s2447_s11] sm:$0xff]  }
 0x44c   : > { %v784_v41 = vpop.xlane.xlu0 %783 }
 0x44d   : > { %1883 = vrcp.f32 %v784_v41  ;;  %v1868_v41 = vld [vmem:[%s2447_s11 + $0x10] sm:$0xff]  }
 0x450   : > { %v1149_v57 = vpop.permute.xlu0 %1148 }
 0x451   : > { %v1154_v60 = vsel %vm732_vm3, %v1149_v57, 0 }
 0x45a   : > { %v1884_v42 = vpop.eup %1883 }
 0x45b   : > { %v786_v43 = vmul.f32 %v1884_v42, %v1876_v18  ;;  %v1869_v42 = vld [vmem:[%s2447_s11 + $0x8] sm:$0xff]  }
 0x45d   : > { %v787_v45 = vpack.c.bf16 %v786_v43, %v786_v43  ;;  %v1605_v43 = vld [vmem:[#allocation8] ss:$0 sm:$0xff] }
 0x45f   : > { %1692 = vmatmul.mubr.msk.bf16.vlgmr.msra.gmra.mxu1 %vm728_vm4, %v787_v45 }
 0x460   : > { %1702 = vmatpush3.bf16.msra.mxu1 %v910_v46  ;;  %1703 = vmatprep.mubr.msk.bf16.mxu1 %vm2032_vm1, %v2031_v4 }
 0x461   : > { %1713 = vmatprep.subr.bf16.mxu1 %v2031_v4 }
 0x47e   : > { %v896_v47 = vpop.xlane.xlu1 %895 }
 0x47f   : > { %1885 = vrcp.f32 %v896_v47 }
 0x482   : > { %v1018_v48 = vpop.xlane.xlu1 %1017 }
 0x483   : > { %1887 = vrcp.f32 %v1018_v48 }
 0x486   : > { %v1140_v49 = vpop.xlane.xlu1 %1139 }
 0x487   : > { %1889 = vrcp.f32 %v1140_v49 }
 0x48a   : > { %v1027_v52 = vpop.permute.xlu1 %1026 }
 0x48b   : > { %v1032_v55 = vsel %vm732_vm3, %v1027_v52, 0 }
 0x48c   : > { %v1886_v50 = vpop.eup %1885 }
 0x48d   : > { %v898_v51 = vmul.f32 %v1886_v50, %v1878_v34 }
 0x48f   : > { %v899_v53 = vpack.c.bf16 %v898_v51, %v898_v51  ;;  %v1601_v51 = vld [vmem:[#allocation5] ss:$0 sm:$0xff] }
 0x490   : > { %v1888_v54 = vpop.eup %1887 }
 0x491   : > { %1704 = vmatmul.mubr.msk.bf16.vlgmr.msra.gmra.mxu1 %vm728_vm4, %v899_v53  ;;  %v1020_v56 = vmul.f32 %v1888_v54, %v1880_v36  ;;  %v1609_v53 = vld [vmem:[%s2448_s12] ss:$0 sm:$0xff] }
 0x492   : > { %1714 = vmatpush3.bf16.msra.mxu1 %v1032_v55  ;;  %1715 = vmatprep.mubr.msk.bf16.mxu1 %vm2032_vm1, %v2031_v4 }
 0x493   : > { %1725 = vmatprep.subr.bf16.mxu1 %v2031_v4  ;;  %v1021_v58 = vpack.c.bf16 %v1020_v56, %v1020_v56 }
 0x494   : > { %v1890_v59 = vpop.eup %1889 }
 0x495   : > { %v1142_v61 = vmul.f32 %v1890_v59, %v1882_v38  ;;  %v1865_v38 = vld [vmem:[%s2447_s11 + $0x28] sm:$0xff]  }
 0x497   : > { %v1143_v63 = vpack.c.bf16 %v1142_v61, %v1142_v61 }
 0x499   : > { %1716 = vmatmul.mubr.msk.bf16.vlgmr.msra.gmra.mxu1 %vm728_vm4, %v1021_v58 }
 0x49a   : > { %1726 = vmatpush3.bf16.msra.mxu1 %v1154_v60  ;;  %1727 = vmatprep.mubr.msk.bf16.mxu1 %vm2032_vm1, %v2031_v4 }
 0x49b   : > { %1739 = vmatprep.subr.bf16.mxu1 %v2031_v4 }
 0x4a1   : > { %1728 = vmatmul.mubr.msk.bf16.vlgmr.msra.gmra.mxu1 %vm728_vm4, %v1143_v63 }
 0x4a2   : > { %1740 = vmatpush3.bf16.msra.mxu1 %v1859_v62  ;;  %1743 = vmatprep.mubr.msk.bf16.mxu1 %vm2032_vm1, %v2031_v4 }
 0x4a3   : > { %1741 = vmatprep.subr.bf16.mxu1 %v2031_v4 }
 0x4a6   : > { %1742 = vmatpush3.bf16.msra.mxu1 %v1860_v2 }
 0x4a9   : > { %1744 = vmatmul.mubr.msk.bf16.vlgmr.msra.gmra.mxu1 %vm483_vm0, %v659_v5 }
 0x51f   : > { %v829_v6 = vpop.f32.mrf.mxu1 }
 0x520   : > { %v835_v7 = vpack.c.bf16 %v829_v6, %v829_v6 }
 0x521   : > { %v1693_v8 = vpop.f32.mrf.mxu1 }
 0x522   : > { %837 = vst.msk [vmem:[#allocation4] sm:$0xf] %vm615_vm2, %v835_v7 }
 0x523   : > { %v832_v9 = vpop.f32.mrf.mxu1 }
 0x525   : > { %v1694_v10 = vpop.f32.mrf.mxu1 }
 0x551   : > { %v946_v11 = vpop.f32.mrf.mxu1 }
 0x552   : > { %v1627_v12 = vpack.c.bf16 %v946_v11, %v946_v11 }
 0x553   : > { %v1705_v13 = vpop.f32.mrf.mxu1 }
 0x554   : > { %956 = vrot.lane.b32.xlu1 %v1627_v12, %s2037_s17 }
 0x555   : > { %v949_v14 = vpop.f32.mrf.mxu1 }
 0x557   : > { %v1706_v15 = vpop.f32.mrf.mxu1 }
 0x559   : > { %v1068_v16 = vpop.f32.mrf.mxu1 }
 0x55a   : > { %v1628_v18 = vpack.c.bf16 %v1068_v16, %v1068_v16 }
 0x55b   : > { %v1717_v20 = vpop.f32.mrf.mxu1 }
 0x55c   : > { %1078 = vrot.lane.b32.xlu1 %v1628_v18, %s2038_s29  ;;  %s1619_s29 = sshll.u32 %s2019_s28, 7  ;;  %s1454_s28 = scalar_lea.sflag [#allocation7], %s469_s19 }
 0x55d   : > { %v1071_v21 = vpop.f32.mrf.mxu1  ;;  %s2389_s15 = scalar_lea.hbm %s2449_s13, %s1619_s29 }
 0x55f   : > { %v1718_v22 = vpop.f32.mrf.mxu1 }
 0x561   : > { %v1190_v23 = vpop.f32.mrf.mxu1 }
 0x562   : > { %v1629_v24 = vpack.c.bf16 %v1190_v23, %v1190_v23 }
 0x563   : > { %v1729_v25 = vpop.f32.mrf.mxu1 }
 0x564   : > { %1200 = vrot.lane.b32.xlu1 %v1629_v24, %s2039_s16  ;;  %s471_s16 = scalar_lea.vmem [#allocation10], %s1569_s14  ;;  %s2040_s14 = smov [#allocation10]  }
 0x565   : > { %v1193_v26 = vpop.f32.mrf.mxu1  ;;  %s1468_s21 = sshll.u32 %s471_s16, 4  ;;  %s1947_s24 = sshll.u32 %s2040_s14, 4  ;;  %s2391_s21 = int_to_ptr.vmem [resolvable:$true] %s1468_s21  ;;  %s1948_s24 = int_to_ptr.vmem [resolvable:$false] %s1947_s24 }
 0x566   : > { %s1943_s17 = scalar_lea.vmem %s2391_s21, 128  ;;  %s1949_s27 = scalar_lea.vmem %s1948_s24, 256 }
 0x567   : > { %v1730_v27 = vpop.f32.mrf.mxu1  ;;  %p1944_p8 = scmp.ne.s32.totalorder %s2391_s21, %s1943_s17  ;;  %p1950_p0 = scmp.lt.s32.totalorder %s2391_s21, %s1948_s24 }
 0x568   : > { %p1951_p6 = scmp.lt.s32.totalorder %s1949_s27, %s1943_s17 }
 0x569   : > { %v1333_v28 = vpop.f32.mrf.mxu1  ;;  %p1945_p11 = pnand %p1944_p8, %p2466_p10 }
 0x56a   : > { %v1334_v45 = vadd.f32 %v1605_v43, %v1333_v28  ;;  %p1952_p7 = por %p1951_p6, %p1950_p0 }
 0x56b   : > { %v1745_v29 = vpop.f32.mrf.mxu1  ;;  %p1946_p13 = pneg %p1945_p11 }
 0x56c   : > { %v1339_v46 = vpack.c.bf16 %v1334_v45, %v1334_v45 }
 0x56d   : > { %v1336_v30 = vpop.f32.mrf.mxu1  ;;  %p1953_p9 = pnand %p1952_p7, %p1946_p13 }
 0x56f   : > { %v1746_v31 = vpop.f32.mrf.mxu1 }
 0x5c6   : > { %v957_v32 = vpop.permute.xlu1 %956 }
 0x5c7   : > { %960 = vst.msk [vmem:[#allocation4] sm:$0xf] %vm959_vm6, %v957_v32 }
 0x5ce   : > { %v1079_v33 = vpop.permute.xlu1 %1078 }
 0x5cf   : > { %1082 = vst.msk [vmem:[#allocation4] sm:$0xf] %vm1081_vm7, %v1079_v33 }
 0x5d6   : > { %v1201_v34 = vpop.permute.xlu1 %1200 }
 0x5d7   : > { %1204 = vst.msk [vmem:[#allocation4] sm:$0xf] %vm1203_vm8, %v1201_v34 }
 0x5de   : > { %v1205_v36 = vld [vmem:[#allocation4] sm:$0xf] }
 0x5df   : > { %1736 = vmatmul.mubr.msk.bf16.vlgmr.msra.gmra.mxu0 %vm483_vm0, %v1205_v36 }
 0x5e0   : > { %1748 = vmatpush3.bf16.msra.mxu0 %v1863_v35  ;;  %1763 = vmatprep.mubr.msk.bf16.mxu0 %vm2032_vm1, %v2031_v4 }
 0x5e1   : > { %1749 = vmatprep.subr.bf16.mxu0 %v2031_v4 }
 0x5e4   : > { %1750 = vmatpush3.bf16.msra.mxu0 %v1864_v37 }
 0x5e5   : > { %1751 = vmatprep.subr.bf16.mxu0 %v2031_v4 }
 0x5e8   : > { %1752 = vmatpush3.bf16.msra.mxu0 %v1865_v38 }
 0x5e9   : > { %1753 = vmatprep.subr.bf16.mxu0 %v2031_v4 }
 0x5ec   : > { %1754 = vmatpush3.bf16.msra.mxu0 %v1866_v39 }
 0x5ed   : > { %1755 = vmatprep.subr.bf16.mxu0 %v2031_v4 }
 0x5f0   : > { %1756 = vmatpush3.bf16.msra.mxu0 %v1867_v40 }
 0x5f1   : > { %1757 = vmatprep.subr.bf16.mxu0 %v2031_v4 }
 0x5f4   : > { %1758 = vmatpush3.bf16.msra.mxu0 %v1868_v41 }
 0x5f5   : > { %1759 = vmatprep.subr.bf16.mxu0 %v2031_v4 }
 0x5f8   : > { %1760 = vmatpush3.bf16.msra.mxu0 %v1869_v42 }
 0x5f9   : > { %1761 = vmatprep.subr.bf16.mxu0 %v2031_v4 }
 0x5fc   : > { %1762 = vmatpush3.bf16.msra.mxu0 %v1870_v44 }
 0x5ff   : > { %1764 = vmatmul.mubr.bf16.vlgmr.msra.gmra.mxu0 %v1339_v46 }
 0x69f   : > { %v1266_v47 = vpop.f32.mrf.mxu0 }
 0x6a0   : > { %v1267_v52 = vadd.f32 %v1601_v51, %v1266_v47 }
 0x6a1   : > { %v1737_v48 = vpop.f32.mrf.mxu0 }
 0x6a2   : > { %v1272_v4 = vadd.f32 %v1267_v52, %v2215_v0 }
 0x6a3   : > { %v1269_v49 = vpop.f32.mrf.mxu0 }
 0x6a5   : > { %v1738_v50 = vpop.f32.mrf.mxu0 }
 0x6bf   : > { %v1445_v54 = vpop.f32.mrf.mxu0 }
 0x6c0   : > { %v1446_v55 = vadd.f32 %v1609_v53, %v1445_v54 }
 0x6c1   : > { %v1765_v56 = vpop.f32.mrf.mxu0 }
 0x6c2   : > { %v1451_v57 = vadd.f32 %v1446_v55, %v1272_v4 }
 0x6c3   : > { %v1448_v58 = vpop.f32.mrf.mxu0 }
 0x6c4   : > { %1452 = vst.msk [vmem:[%s471_s16] sm:$0xff] %vm483_vm0, %v1451_v57 }
 0x6c5   : > { %v1766_v59 = vpop.f32.mrf.mxu0 }
 0x6c6   : > { %1956 = shalt.err (!%p1953_p9)
}
 0x6c7   : > { %s1957_s29 = scalar_lea.hbm %s2389_s15, 128  ;;  %s1961_s22 = scalar_lea.hbm %s2449_s13, 256 }
 0x6c8   : > { %p1958_p12 = scmp.ne.s32.totalorder %s2389_s15, %s1957_s29  ;;  %p1962_p5 = scmp.lt.s32.totalorder %s2389_s15, %s2449_s13 }
 0x6c9   : > { %p1963_p3 = scmp.lt.s32.totalorder %s1961_s22, %s1957_s29 }
 0x6ca   : > { %p1959_p1 = pnand %p1958_p12, %p2466_p10 }
 0x6cb   : > { %p1964_p4 = por %p1963_p3, %p1962_p5 }
 0x6cc   : > { %p1960_p2 = pneg %p1959_p1 }
 0x6ce   : > { %p1965_p8 = pnand %p1964_p4, %p1960_p2 }
 0x6d0   : > { %1968 = shalt.err (!%p1965_p8)
}
 0x6d1   : > { %1775 = dma.vmem_to_hbm [thread:$0]  (%p2466_p10), %s2391_s21, 128, %s2389_s15, %s1454_s28  }
 0x6d2 PF: > { %p1792_p11 = scmp.ge.s32.totalorder %s2027_s30, 2  ;;  %s1480_s17 = sand.u32 1, %s2007_s25  }
 0x6d3   : > { %p2467_p13 = scmp.ne.s32.totalorder %s2460_s20, 0  ;;  %s1481_s24 = scalar_lea.sflag [#allocation7], %s1480_s17 }
 0x6d5   : > { %p1785_p0 = pnand %p1792_p11, %p2467_p13 }
 0x6d7   : > { %p1786_p6 = pneg %p1785_p0 }
 0x6d9   : > { %2002 = dma.done.wait (%p1786_p6), %s1481_s24, 128  }
 0x6da   : > { %2004 = vsyncadd (%p1786_p6), %s1481_s24, 4294967168  ;;  %s28_s30 = sadd.s32 1, %s2027_s30   ;;  %s2468_s18 = sld [smem:[#allocation14_spill]] }
 0x6db   : > { %p25_p7 = scmp.ge.s32.totalorder %s28_s30, 4   ;;  %s2469_s27 = sld [smem:[#allocation17_spill]] }
 0x6dc   : > { %s2470_s28 = sld [smem:[#allocation15_spill]]  ;;  %s2472_s25 = smov %s2011_s26 }
 0x6dd   : > { %s2471_s29 = sld [smem:[#allocation16_spill]]  ;;  %27 = sbr.rel (!%p25_p7) target bundleno = 6 (0x6), region = 121 }
 0x6e0   : > { %s2473_s26 = smov %s2468_s18 }
 0x6e2   :  { %1486 = vsyncpa [#allocation6], 1 }
 0x6e3   :  { %1488 = vsyncpa [#allocation6 + $0x1], 1 }
 0x6e4   :  { %1489 = vsyncpa [#allocation9], 1 }
 0x6e5   :  { %1490 = vsyncpa [#allocation7], 1 }
 0x6e6   :  { %1492 = vsyncpa [#allocation7 + $0x1], 1 }

</bundles_post_ra>
